<compile_context>
chip_gen: v7x
topology: tpu7x:2x2x1
jax: 0.10.0
libtpu: 0.0.40
codegen_flags: <defaults>
</compile_context>

<pallas_src>
import jax
import jax.numpy as jnp
from jax import lax
from jax.experimental import pallas as pl
from jax.experimental.pallas import tpu as pltpu

# ----------------- small config consistent with the module -----------------
EMBED_DIMS = 32
MEMORY_ENCODER = [16, 32]      # hidden widths of memory_encoder
QUERY_ENCODER = [16, 32]       # hidden widths of query_encoder
REGRESSION_MLP = [32]          # hidden width of memory_mlp / query_mlp
QUERY_POINT_DIMS = 4           # channels of geo_memory_points (memory_encoder input)
MEMORY_POINT_DIMS = 4          # channels of geo_query_points  (query_encoder input)

BS = 2                         # batch
PTS_NUM = 128                  # memory points per sample
PP_NUM = 4                     # query proposals per sample
QPTS_NUM = 128                 # points per query proposal

# -------------------- packed parameter-blob layout (static) -----------------
W_COLS = 128                   # weight blob lane width (>= max K = 96)
_W_LAYOUT = (
    # name, fused rows (Cout), valid cols (K)
    ("me1",  MEMORY_ENCODER[0],                      QUERY_POINT_DIMS),      # (16, 4)
    ("qe1",  QUERY_ENCODER[0],                       MEMORY_POINT_DIMS),     # (16, 4)
    ("enc2", MEMORY_ENCODER[1] + QUERY_ENCODER[1],
             MEMORY_ENCODER[0] + QUERY_ENCODER[0]),                          # (64, 32) block-diag
    ("enc3", 2 * EMBED_DIMS + EMBED_DIMS,
             MEMORY_ENCODER[1] + QUERY_ENCODER[1]),                          # (96, 64) block-diag
    ("mm1",  REGRESSION_MLP[0], MEMORY_ENCODER[1] + 2 * EMBED_DIMS),         # (32, 96)
    ("mm2",  EMBED_DIMS,        REGRESSION_MLP[0]),                          # (32, 32)
    ("ql1",  REGRESSION_MLP[0], EMBED_DIMS),                                 # (32, 32)
    ("ql2",  EMBED_DIMS,        REGRESSION_MLP[0]),                          # (32, 32)
)
_W_OFF = {}
_off = 0
for _name, _r, _c in _W_LAYOUT:
    assert _off % 16 == 0 and _c <= W_COLS            # bf16 sublane-tile alignment
    _W_OFF[_name] = (_off, _r, _c)
    _off += _r
W_ROWS = _off                                          # 320


# ------------------------------- parameters ---------------------------------
def init_params(key):
    """Random torch-equivalent params (eval-mode BN folded), packed into 2 blobs."""
    layer_dims = [
        # memory_encoder: 4 -> 16 -> 32 -> 2*E   (conv k=1 + BN + ReLU)
        ("me1", QUERY_POINT_DIMS, MEMORY_ENCODER[0]),
        ("me2", MEMORY_ENCODER[0], MEMORY_ENCODER[1]),
        ("me3", MEMORY_ENCODER[1], 2 * EMBED_DIMS),
        # memory_mlp: (ME1 + 2*E) -> RM0 -> E
        ("mm1", MEMORY_ENCODER[1] + 2 * EMBED_DIMS, REGRESSION_MLP[0]),
        ("mm2", REGRESSION_MLP[0], EMBED_DIMS),
        # query_encoder: 4 -> 16 -> 32 -> E
        ("qe1", MEMORY_POINT_DIMS, QUERY_ENCODER[0]),
        ("qe2", QUERY_ENCODER[0], QUERY_ENCODER[1]),
        ("qe3", QUERY_ENCODER[1], EMBED_DIMS),
        # query_mlp (linear): E -> RM0 -> E
        ("ql1", EMBED_DIMS, REGRESSION_MLP[0]),
        ("ql2", REGRESSION_MLP[0], EMBED_DIMS),
    ]
    w, b = {}, {}
    keys = jax.random.split(key, len(layer_dims))
    for k, (name, cin, cout) in zip(keys, layer_dims):
        kw, ks, kb = jax.random.split(k, 3)
        wt = jax.random.normal(kw, (cout, cin), jnp.float32) / jnp.sqrt(float(cin))
        s = 1.0 + 0.1 * jax.random.normal(ks, (cout, 1), jnp.float32)  # folded BN scale
        bi = 0.01 * jax.random.normal(kb, (cout, 1), jnp.float32)      # folded BN bias
        w[name] = wt * s            # fold scale into the weight (f32 here, bf16 in blob)
        b[name] = bi

    def blockdiag(a, c):
        top = jnp.concatenate([a, jnp.zeros((a.shape[0], c.shape[1]), a.dtype)], axis=1)
        bot = jnp.concatenate([jnp.zeros((c.shape[0], a.shape[1]), c.dtype), c], axis=1)
        return jnp.concatenate([top, bot], axis=0)

    fused_w = {
        "me1": w["me1"], "qe1": w["qe1"],
        "enc2": blockdiag(w["me2"], w["qe2"]),
        "enc3": blockdiag(w["me3"], w["qe3"]),
        "mm1": w["mm1"], "mm2": w["mm2"],
        "ql1": w["ql1"], "ql2": w["ql2"],
    }
    fused_b = {
        "me1": b["me1"], "qe1": b["qe1"],
        "enc2": jnp.concatenate([b["me2"], b["qe2"]], axis=0),
        "enc3": jnp.concatenate([b["me3"], b["qe3"]], axis=0),
        "mm1": b["mm1"], "mm2": b["mm2"],
        "ql1": b["ql1"], "ql2": b["ql2"],
    }
    w_rows, b_rows = [], []
    for name, rows, cols in _W_LAYOUT:
        wt = fused_w[name]
        assert wt.shape == (rows, cols), (name, wt.shape)
        w_rows.append(jnp.pad(wt, ((0, 0), (0, W_COLS - cols))))
        b_rows.append(fused_b[name])
    return {
        "w": jnp.concatenate(w_rows, axis=0).astype(jnp.bfloat16),   # (320, 128) bf16
        "b": jnp.concatenate(b_rows, axis=0),                        # (320, 1)   f32
    }


# --------------------------------- kernel -----------------------------------
def _make_kernel(bs, pts, pp, qpts):
    n_mem = bs * pts                 # 256   memory lanes
    n_qry = bs * pp * qpts           # 1024  query lanes
    e = EMBED_DIMS                   # 32
    c_int = MEMORY_ENCODER[1]        # 32   _points_intermediate channels
    c_enc = 2 * EMBED_DIMS           # 64   memory-encoder output channels
    bf16, f32 = jnp.bfloat16, jnp.float32
    dn_ck = (((1,), (1,)), ((), ())) # (Cout,K) . (N,K) -> (Cout,N)

    def w_slab(w_ref, name):
        o, r, c = _W_OFF[name]
        return w_ref[o:o + r, 0:c]

    def b_slab(b_ref, name):
        o, r, _ = _W_OFF[name]
        return b_ref[o:o + r, :]

    def kernel(m_ref, q_ref, w_ref, b_ref, mem_out_ref, q_out_ref):
        # ---- encoder layer 1: contract the raw (points, 4) channel axis in f32 ----
        xm = m_ref[...]                                         # (n_mem, 4) f32
        xq = q_ref[...]                                         # (n_qry, 4) f32
        h1m = jnp.maximum(
            lax.dot_general(w_slab(w_ref, "me1").astype(f32), xm, dn_ck,
                            preferred_element_type=f32)
            + b_slab(b_ref, "me1"), 0.0)                        # (16, n_mem)
        c1q = jnp.maximum(
            lax.dot_general(w_slab(w_ref, "qe1").astype(f32), xq, dn_ck,
                            preferred_element_type=f32)
            + b_slab(b_ref, "qe1"), 0.0)                        # (16, n_qry)

        # ---- encoder layers 2 & 3: block-diagonal fused dots (bf16, f32 acc) ------
        # activation rows = [memory | query], lanes = [memory n_mem | query n_qry];
        # off-diagonal quadrants hold garbage that is never read.
        a1 = jnp.concatenate(
            [jnp.concatenate([h1m.astype(bf16),
                              jnp.zeros((MEMORY_ENCODER[0], n_qry), bf16)], axis=1),
             jnp.concatenate([jnp.zeros((QUERY_ENCODER[0], n_mem), bf16),
                              c1q.astype(bf16)], axis=1)],
            axis=0)                                             # (32, n_mem + n_qry)
        a2 = jnp.maximum(jnp.dot(w_slab(w_ref, "enc2"), a1,
                                 preferred_element_type=f32)
                         + b_slab(b_ref, "enc2"), 0.0)          # (64, 1280)
        a2b = a2.astype(bf16)
        a3 = jnp.maximum(jnp.dot(w_slab(w_ref, "enc3"), a2b,
                                 preferred_element_type=f32)
                         + b_slab(b_ref, "enc3"), 0.0)          # (96, 1280)

        # ---- memory branch head ---------------------------------------------------
        h2_mem = a2b[0:c_int, 0:n_mem]                          # (32, 256) intermediate
        h3_mem = a3[0:c_enc, 0:n_mem]                           # (64, 256)
        # per-batch-element max over the point lanes, broadcast back over points
        pooled = jnp.concatenate(
            [jnp.broadcast_to(
                jnp.max(h3_mem[:, i * pts:(i + 1) * pts], axis=1, keepdims=True),
                (c_enc, pts))
             for i in range(bs)], axis=1).astype(bf16)          # (64, 256)
        x_mm1 = jnp.concatenate([h2_mem, pooled], axis=0)       # (96, 256) torch.cat order
        m1 = jnp.maximum(jnp.dot(w_slab(w_ref, "mm1"), x_mm1,
                                 preferred_element_type=f32)
                         + b_slab(b_ref, "mm1"), 0.0)           # (32, 256)
        mem = jnp.maximum(jnp.dot(w_slab(w_ref, "mm2"), m1.astype(bf16),
                                  preferred_element_type=f32)
                          + b_slab(b_ref, "mm2"), 0.0)          # (32, 256)
        for i in range(bs):                                     # lane-dense (E, pts) stores
            mem_out_ref[i] = mem[:, i * pts:(i + 1) * pts]

        # ---- query branch head ------------------------------------------------------
        c3q = a3[c_enc:c_enc + e, n_mem:n_mem + n_qry]          # (32, 1024)
        gq = jnp.concatenate(
            [jnp.max(c3q[:, g * qpts:(g + 1) * qpts], axis=1, keepdims=True)
             for g in range(bs * pp)], axis=1).astype(bf16)     # (32, bs*pp) b-major
        l1 = jnp.maximum(jnp.dot(w_slab(w_ref, "ql1"), gq,
                                 preferred_element_type=f32)
                         + b_slab(b_ref, "ql1"), 0.0)           # (32, 8)
        qf = jnp.maximum(jnp.dot(w_slab(w_ref, "ql2"), l1.astype(bf16),
                                 preferred_element_type=f32)
                         + b_slab(b_ref, "ql2"), 0.0)           # (32, 8)
        for i in range(bs):
            q_out_ref[i] = qf[:, i * pp:(i + 1) * pp]

    return kernel


# -------------------------------- forward -----------------------------------
def geometry_transformer_forward(geo_memory_points, geo_query_points, params):
    bs, pts, cm = geo_memory_points.shape
    _, pp, qpts, cq = geo_query_points.shape
    assert cm == QUERY_POINT_DIMS and cq == MEMORY_POINT_DIMS
    assert pts % 128 == 0 and qpts % 128 == 0, "point counts must be 128-lane aligned"

    # free reshapes only -- no wrapper transposes; the kernel contracts the
    # channel axis of the raw (points, C) layout directly.
    m2 = geo_memory_points.reshape(bs * pts, cm)
    q2 = geo_query_points.reshape(bs * pp * qpts, cq)

    kernel = _make_kernel(bs, pts, pp, qpts)
    vmem = lambda: pl.BlockSpec(memory_space=pltpu.MemorySpace.VMEM)

    memory, query = pl.pallas_call(
        kernel,
        out_shape=(jax.ShapeDtypeStruct((bs, EMBED_DIMS, pts), jnp.float32),
                   jax.ShapeDtypeStruct((bs, EMBED_DIMS, pp), jnp.float32)),
        in_specs=[vmem(), vmem(), vmem(), vmem()],
        out_specs=(vmem(), vmem()),
    )(m2, q2, params["w"], params["b"])

    # memory: (bs, E, pts), query: (bs, E, pp) -- already in the torch layouts.
    # TODO(synk): GeometryHead decoder + TargetAssigner (preds/targets/boxes)
    # and the losses are external modules not defined in the given file.
    return {"query": query, "memory": memory}


geometry_transformer_forward_jit = jax.jit(geometry_transformer_forward)


if __name__ == "__main__":
    key = jax.random.PRNGKey(0)
    kp, km, kq = jax.random.split(key, 3)
    params = init_params(kp)
    geo_memory_points = jax.random.normal(
        km, (BS, PTS_NUM, QUERY_POINT_DIMS), jnp.float32)
    geo_query_points = jax.random.normal(
        kq, (BS, PP_NUM, QPTS_NUM, MEMORY_POINT_DIMS), jnp.float32)

    out = geometry_transformer_forward_jit(
        geo_memory_points, geo_query_points, params)
    out = jax.tree_util.tree_map(jax.block_until_ready, out)

    assert out["memory"].shape == (BS, EMBED_DIMS, PTS_NUM)
    assert out["query"].shape == (BS, EMBED_DIMS, PP_NUM)
    assert bool(jnp.all(jnp.isfinite(out["memory"])))
    assert bool(jnp.all(jnp.isfinite(out["query"])))
    print("KERNEL_OK")
</pallas_src>

<mosaic_0001>
module attributes {stable_mosaic.version = 11 : i64} {
  func.func @kernel(%arg0: memref<256x4xf32, #tpu.memory_space<vmem>>, %arg1: memref<1024x4xf32, #tpu.memory_space<vmem>>, %arg2: memref<320x128xbf16, #tpu.memory_space<vmem>>, %arg3: memref<320x1xf32, #tpu.memory_space<vmem>>, %arg4: memref<2x32x128xf32, #tpu.memory_space<vmem>>, %arg5: memref<2x32x4xf32, #tpu.memory_space<vmem>>) attributes {dimension_semantics = [], scalar_prefetch = 0 : i64, scratch_operands = 0 : i64, tpu.core_type = #tpu.core_type<tc>} {
    %c0 = arith.constant 0 : index
    %c0_0 = arith.constant 0 : index
    %0 = vector.load %arg0[%c0, %c0_0] : memref<256x4xf32, #tpu.memory_space<vmem>>, vector<256x4xf32>
    %c0_1 = arith.constant 0 : index
    %c0_2 = arith.constant 0 : index
    %1 = vector.load %arg1[%c0_1, %c0_2] : memref<1024x4xf32, #tpu.memory_space<vmem>>, vector<1024x4xf32>
    %c0_3 = arith.constant 0 : index
    %c0_4 = arith.constant 0 : index
    %2 = vector.load %arg2[%c0_3, %c0_4] : memref<320x128xbf16, #tpu.memory_space<vmem>>, vector<16x4xbf16>
    %3 = arith.extf %2 : vector<16x4xbf16> to vector<16x4xf32>
    %cst = arith.constant dense<0.000000e+00> : vector<16x256xf32>
    %4 = tpu.matmul %3, %0, %cst {dimension_numbers = #tpu.dot_dimension_numbers<[1], [1], [0], [0], [0, 0, 1, 0], [], []>} : vector<16x4xf32>, vector<256x4xf32>, vector<16x256xf32> -> vector<16x256xf32>
    %c0_5 = arith.constant 0 : index
    %c0_6 = arith.constant 0 : index
    %5 = vector.load %arg3[%c0_5, %c0_6] : memref<320x1xf32, #tpu.memory_space<vmem>>, vector<16x1xf32>
    %6 = vector.broadcast %5 : vector<16x1xf32> to vector<16x256xf32>
    %7 = arith.addf %4, %6 : vector<16x256xf32>
    %cst_7 = arith.constant 0.000000e+00 : f32
    %8 = vector.broadcast %cst_7 : f32 to vector<16x256xf32>
    %9 = arith.maximumf %7, %8 : vector<16x256xf32>
    %c16 = arith.constant 16 : index
    %c0_8 = arith.constant 0 : index
    %10 = vector.load %arg2[%c16, %c0_8] : memref<320x128xbf16, #tpu.memory_space<vmem>>, vector<16x4xbf16>
    %11 = arith.extf %10 : vector<16x4xbf16> to vector<16x4xf32>
    %cst_9 = arith.constant dense<0.000000e+00> : vector<16x1024xf32>
    %12 = tpu.matmul %11, %1, %cst_9 {dimension_numbers = #tpu.dot_dimension_numbers<[1], [1], [0], [0], [0, 0, 1, 0], [], []>} : vector<16x4xf32>, vector<1024x4xf32>, vector<16x1024xf32> -> vector<16x1024xf32>
    %c16_10 = arith.constant 16 : index
    %c0_11 = arith.constant 0 : index
    %13 = vector.load %arg3[%c16_10, %c0_11] : memref<320x1xf32, #tpu.memory_space<vmem>>, vector<16x1xf32>
    %14 = vector.broadcast %13 : vector<16x1xf32> to vector<16x1024xf32>
    %15 = arith.addf %12, %14 : vector<16x1024xf32>
    %cst_12 = arith.constant 0.000000e+00 : f32
    %16 = vector.broadcast %cst_12 : f32 to vector<16x1024xf32>
    %17 = arith.maximumf %15, %16 : vector<16x1024xf32>
    %18 = arith.truncf %9 : vector<16x256xf32> to vector<16x256xbf16>
    %cst_13 = arith.constant 0.000000e+00 : bf16
    %19 = vector.broadcast %cst_13 : bf16 to vector<16x1024xbf16>
    %20 = tpu.concatenate %18, %19 in 1 : vector<16x256xbf16>, vector<16x1024xbf16> -> vector<16x1280xbf16>
    %cst_14 = arith.constant 0.000000e+00 : bf16
    %21 = vector.broadcast %cst_14 : bf16 to vector<16x256xbf16>
    %22 = arith.truncf %17 : vector<16x1024xf32> to vector<16x1024xbf16>
    %23 = tpu.concatenate %21, %22 in 1 : vector<16x256xbf16>, vector<16x1024xbf16> -> vector<16x1280xbf16>
    %24 = tpu.concatenate %20, %23 in 0 : vector<16x1280xbf16>, vector<16x1280xbf16> -> vector<32x1280xbf16>
    %c32 = arith.constant 32 : index
    %c0_15 = arith.constant 0 : index
    %25 = vector.load %arg2[%c32, %c0_15] : memref<320x128xbf16, #tpu.memory_space<vmem>>, vector<64x32xbf16>
    %cst_16 = arith.constant dense<0.000000e+00> : vector<64x1280xf32>
    %26 = tpu.matmul %25, %24, %cst_16 {dimension_numbers = #tpu.dot_dimension_numbers<[1], [0], [0], [1], [0, 0, 1, 1], [], []>} : vector<64x32xbf16>, vector<32x1280xbf16>, vector<64x1280xf32> -> vector<64x1280xf32>
    %c32_17 = arith.constant 32 : index
    %c0_18 = arith.constant 0 : index
    %27 = vector.load %arg3[%c32_17, %c0_18] : memref<320x1xf32, #tpu.memory_space<vmem>>, vector<64x1xf32>
    %28 = vector.broadcast %27 : vector<64x1xf32> to vector<64x1280xf32>
    %29 = arith.addf %26, %28 : vector<64x1280xf32>
    %cst_19 = arith.constant 0.000000e+00 : f32
    %30 = vector.broadcast %cst_19 : f32 to vector<64x1280xf32>
    %31 = arith.maximumf %29, %30 : vector<64x1280xf32>
    %32 = arith.truncf %31 : vector<64x1280xf32> to vector<64x1280xbf16>
    %c96 = arith.constant 96 : index
    %c0_20 = arith.constant 0 : index
    %33 = vector.load %arg2[%c96, %c0_20] : memref<320x128xbf16, #tpu.memory_space<vmem>>, vector<96x64xbf16>
    %cst_21 = arith.constant dense<0.000000e+00> : vector<96x1280xf32>
    %34 = tpu.matmul %33, %32, %cst_21 {dimension_numbers = #tpu.dot_dimension_numbers<[1], [0], [0], [1], [0, 0, 1, 1], [], []>} : vector<96x64xbf16>, vector<64x1280xbf16>, vector<96x1280xf32> -> vector<96x1280xf32>
    %c96_22 = arith.constant 96 : index
    %c0_23 = arith.constant 0 : index
    %35 = vector.load %arg3[%c96_22, %c0_23] : memref<320x1xf32, #tpu.memory_space<vmem>>, vector<96x1xf32>
    %36 = vector.broadcast %35 : vector<96x1xf32> to vector<96x1280xf32>
    %37 = arith.addf %34, %36 : vector<96x1280xf32>
    %cst_24 = arith.constant 0.000000e+00 : f32
    %38 = vector.broadcast %cst_24 : f32 to vector<96x1280xf32>
    %39 = arith.maximumf %37, %38 : vector<96x1280xf32>
    %40 = vector.extract_strided_slice %32 {offsets = [0, 0], sizes = [32, 256], strides = [1, 1]} : vector<64x1280xbf16> to vector<32x256xbf16>
    %41 = vector.extract_strided_slice %39 {offsets = [0, 0], sizes = [64, 256], strides = [1, 1]} : vector<96x1280xf32> to vector<64x256xf32>
    %42 = vector.extract_strided_slice %41 {offsets = [0, 0], sizes = [64, 128], strides = [1, 1]} : vector<64x256xf32> to vector<64x128xf32>
    %cst_25 = arith.constant dense<0xFF800000> : vector<64xf32>
    %43 = vector.multi_reduction <maximumf>, %42, %cst_25 [1] : vector<64x128xf32> to vector<64xf32>
    %44 = vector.shape_cast %43 : vector<64xf32> to vector<64x1xf32>
    %45 = vector.shape_cast %44 : vector<64x1xf32> to vector<64x1xf32>
    %46 = vector.broadcast %45 : vector<64x1xf32> to vector<64x128xf32>
    %47 = vector.extract_strided_slice %41 {offsets = [0, 128], sizes = [64, 128], strides = [1, 1]} : vector<64x256xf32> to vector<64x128xf32>
    %cst_26 = arith.constant dense<0xFF800000> : vector<64xf32>
    %48 = vector.multi_reduction <maximumf>, %47, %cst_26 [1] : vector<64x128xf32> to vector<64xf32>
    %49 = vector.shape_cast %48 : vector<64xf32> to vector<64x1xf32>
    %50 = vector.shape_cast %49 : vector<64x1xf32> to vector<64x1xf32>
    %51 = vector.broadcast %50 : vector<64x1xf32> to vector<64x128xf32>
    %52 = tpu.concatenate %46, %51 in 1 : vector<64x128xf32>, vector<64x128xf32> -> vector<64x256xf32>
    %53 = arith.truncf %52 : vector<64x256xf32> to vector<64x256xbf16>
    %54 = tpu.concatenate %40, %53 in 0 : vector<32x256xbf16>, vector<64x256xbf16> -> vector<96x256xbf16>
    %c192 = arith.constant 192 : index
    %c0_27 = arith.constant 0 : index
    %55 = vector.load %arg2[%c192, %c0_27] : memref<320x128xbf16, #tpu.memory_space<vmem>>, vector<32x96xbf16>
    %cst_28 = arith.constant dense<0.000000e+00> : vector<32x256xf32>
    %56 = tpu.matmul %55, %54, %cst_28 {dimension_numbers = #tpu.dot_dimension_numbers<[1], [0], [0], [1], [0, 0, 1, 1], [], []>} : vector<32x96xbf16>, vector<96x256xbf16>, vector<32x256xf32> -> vector<32x256xf32>
    %c192_29 = arith.constant 192 : index
    %c0_30 = arith.constant 0 : index
    %57 = vector.load %arg3[%c192_29, %c0_30] : memref<320x1xf32, #tpu.memory_space<vmem>>, vector<32x1xf32>
    %58 = vector.broadcast %57 : vector<32x1xf32> to vector<32x256xf32>
    %59 = arith.addf %56, %58 : vector<32x256xf32>
    %cst_31 = arith.constant 0.000000e+00 : f32
    %60 = vector.broadcast %cst_31 : f32 to vector<32x256xf32>
    %61 = arith.maximumf %59, %60 : vector<32x256xf32>
    %c224 = arith.constant 224 : index
    %c0_32 = arith.constant 0 : index
    %62 = vector.load %arg2[%c224, %c0_32] : memref<320x128xbf16, #tpu.memory_space<vmem>>, vector<32x32xbf16>
    %63 = arith.truncf %61 : vector<32x256xf32> to vector<32x256xbf16>
    %cst_33 = arith.constant dense<0.000000e+00> : vector<32x256xf32>
    %64 = tpu.matmul %62, %63, %cst_33 {dimension_numbers = #tpu.dot_dimension_numbers<[1], [0], [0], [1], [0, 0, 1, 1], [], []>} : vector<32x32xbf16>, vector<32x256xbf16>, vector<32x256xf32> -> vector<32x256xf32>
    %c224_34 = arith.constant 224 : index
    %c0_35 = arith.constant 0 : index
    %65 = vector.load %arg3[%c224_34, %c0_35] : memref<320x1xf32, #tpu.memory_space<vmem>>, vector<32x1xf32>
    %66 = vector.broadcast %65 : vector<32x1xf32> to vector<32x256xf32>
    %67 = arith.addf %64, %66 : vector<32x256xf32>
    %cst_36 = arith.constant 0.000000e+00 : f32
    %68 = vector.broadcast %cst_36 : f32 to vector<32x256xf32>
    %69 = arith.maximumf %67, %68 : vector<32x256xf32>
    %70 = vector.extract_strided_slice %69 {offsets = [0, 0], sizes = [32, 128], strides = [1, 1]} : vector<32x256xf32> to vector<32x128xf32>
    %c0_37 = arith.constant 0 : index
    %c0_38 = arith.constant 0 : index
    %c0_39 = arith.constant 0 : index
    %71 = vector.load %arg4[%c0_37, %c0_38, %c0_39] : memref<2x32x128xf32, #tpu.memory_space<vmem>>, vector<1x32x128xf32>
    %72 = vector.shape_cast %71 : vector<1x32x128xf32> to vector<32x128xf32>
    %73 = vector.shape_cast %70 : vector<32x128xf32> to vector<1x32x128xf32>
    tpu.vector_store %arg4[%c0_37, %c0_38, %c0_39], %73 {strides = array<i32>} : memref<2x32x128xf32, #tpu.memory_space<vmem>>, vector<1x32x128xf32>,
    %74 = vector.extract_strided_slice %69 {offsets = [0, 128], sizes = [32, 128], strides = [1, 1]} : vector<32x256xf32> to vector<32x128xf32>
    %c1 = arith.constant 1 : index
    %c0_40 = arith.constant 0 : index
    %c0_41 = arith.constant 0 : index
    %75 = vector.load %arg4[%c1, %c0_40, %c0_41] : memref<2x32x128xf32, #tpu.memory_space<vmem>>, vector<1x32x128xf32>
    %76 = vector.shape_cast %75 : vector<1x32x128xf32> to vector<32x128xf32>
    %77 = vector.shape_cast %74 : vector<32x128xf32> to vector<1x32x128xf32>
    tpu.vector_store %arg4[%c1, %c0_40, %c0_41], %77 {strides = array<i32>} : memref<2x32x128xf32, #tpu.memory_space<vmem>>, vector<1x32x128xf32>,
    %78 = vector.extract_strided_slice %39 {offsets = [64, 256], sizes = [32, 1024], strides = [1, 1]} : vector<96x1280xf32> to vector<32x1024xf32>
    %79 = vector.extract_strided_slice %78 {offsets = [0, 0], sizes = [32, 128], strides = [1, 1]} : vector<32x1024xf32> to vector<32x128xf32>
    %cst_42 = arith.constant dense<0xFF800000> : vector<32xf32>
    %80 = vector.multi_reduction <maximumf>, %79, %cst_42 [1] : vector<32x128xf32> to vector<32xf32>
    %81 = vector.shape_cast %80 : vector<32xf32> to vector<32x1xf32>
    %82 = vector.extract_strided_slice %78 {offsets = [0, 128], sizes = [32, 128], strides = [1, 1]} : vector<32x1024xf32> to vector<32x128xf32>
    %cst_43 = arith.constant dense<0xFF800000> : vector<32xf32>
    %83 = vector.multi_reduction <maximumf>, %82, %cst_43 [1] : vector<32x128xf32> to vector<32xf32>
    %84 = vector.shape_cast %83 : vector<32xf32> to vector<32x1xf32>
    %85 = vector.extract_strided_slice %78 {offsets = [0, 256], sizes = [32, 128], strides = [1, 1]} : vector<32x1024xf32> to vector<32x128xf32>
    %cst_44 = arith.constant dense<0xFF800000> : vector<32xf32>
    %86 = vector.multi_reduction <maximumf>, %85, %cst_44 [1] : vector<32x128xf32> to vector<32xf32>
    %87 = vector.shape_cast %86 : vector<32xf32> to vector<32x1xf32>
    %88 = vector.extract_strided_slice %78 {offsets = [0, 384], sizes = [32, 128], strides = [1, 1]} : vector<32x1024xf32> to vector<32x128xf32>
    %cst_45 = arith.constant dense<0xFF800000> : vector<32xf32>
    %89 = vector.multi_reduction <maximumf>, %88, %cst_45 [1] : vector<32x128xf32> to vector<32xf32>
    %90 = vector.shape_cast %89 : vector<32xf32> to vector<32x1xf32>
    %91 = vector.extract_strided_slice %78 {offsets = [0, 512], sizes = [32, 128], strides = [1, 1]} : vector<32x1024xf32> to vector<32x128xf32>
    %cst_46 = arith.constant dense<0xFF800000> : vector<32xf32>
    %92 = vector.multi_reduction <maximumf>, %91, %cst_46 [1] : vector<32x128xf32> to vector<32xf32>
    %93 = vector.shape_cast %92 : vector<32xf32> to vector<32x1xf32>
    %94 = vector.extract_strided_slice %78 {offsets = [0, 640], sizes = [32, 128], strides = [1, 1]} : vector<32x1024xf32> to vector<32x128xf32>
    %cst_47 = arith.constant dense<0xFF800000> : vector<32xf32>
    %95 = vector.multi_reduction <maximumf>, %94, %cst_47 [1] : vector<32x128xf32> to vector<32xf32>
    %96 = vector.shape_cast %95 : vector<32xf32> to vector<32x1xf32>
    %97 = vector.extract_strided_slice %78 {offsets = [0, 768], sizes = [32, 128], strides = [1, 1]} : vector<32x1024xf32> to vector<32x128xf32>
    %cst_48 = arith.constant dense<0xFF800000> : vector<32xf32>
    %98 = vector.multi_reduction <maximumf>, %97, %cst_48 [1] : vector<32x128xf32> to vector<32xf32>
    %99 = vector.shape_cast %98 : vector<32xf32> to vector<32x1xf32>
    %100 = vector.extract_strided_slice %78 {offsets = [0, 896], sizes = [32, 128], strides = [1, 1]} : vector<32x1024xf32> to vector<32x128xf32>
    %cst_49 = arith.constant dense<0xFF800000> : vector<32xf32>
    %101 = vector.multi_reduction <maximumf>, %100, %cst_49 [1] : vector<32x128xf32> to vector<32xf32>
    %102 = vector.shape_cast %101 : vector<32xf32> to vector<32x1xf32>
    %103 = tpu.concatenate %81, %84, %87, %90, %93, %96, %99, %102 in 1 : vector<32x1xf32>, vector<32x1xf32>, vector<32x1xf32>, vector<32x1xf32>, vector<32x1xf32>, vector<32x1xf32>, vector<32x1xf32>, vector<32x1xf32> -> vector<32x8xf32>
    %104 = arith.truncf %103 : vector<32x8xf32> to vector<32x8xbf16>
    %c256 = arith.constant 256 : index
    %c0_50 = arith.constant 0 : index
    %105 = vector.load %arg2[%c256, %c0_50] : memref<320x128xbf16, #tpu.memory_space<vmem>>, vector<32x32xbf16>
    %cst_51 = arith.constant dense<0.000000e+00> : vector<32x8xf32>
    %106 = tpu.matmul %105, %104, %cst_51 {dimension_numbers = #tpu.dot_dimension_numbers<[1], [0], [0], [1], [0, 0, 1, 1], [], []>} : vector<32x32xbf16>, vector<32x8xbf16>, vector<32x8xf32> -> vector<32x8xf32>
    %c256_52 = arith.constant 256 : index
    %c0_53 = arith.constant 0 : index
    %107 = vector.load %arg3[%c256_52, %c0_53] : memref<320x1xf32, #tpu.memory_space<vmem>>, vector<32x1xf32>
    %108 = vector.broadcast %107 : vector<32x1xf32> to vector<32x8xf32>
    %109 = arith.addf %106, %108 : vector<32x8xf32>
    %cst_54 = arith.constant 0.000000e+00 : f32
    %110 = vector.broadcast %cst_54 : f32 to vector<32x8xf32>
    %111 = arith.maximumf %109, %110 : vector<32x8xf32>
    %c288 = arith.constant 288 : index
    %c0_55 = arith.constant 0 : index
    %112 = vector.load %arg2[%c288, %c0_55] : memref<320x128xbf16, #tpu.memory_space<vmem>>, vector<32x32xbf16>
    %113 = arith.truncf %111 : vector<32x8xf32> to vector<32x8xbf16>
    %cst_56 = arith.constant dense<0.000000e+00> : vector<32x8xf32>
    %114 = tpu.matmul %112, %113, %cst_56 {dimension_numbers = #tpu.dot_dimension_numbers<[1], [0], [0], [1], [0, 0, 1, 1], [], []>} : vector<32x32xbf16>, vector<32x8xbf16>, vector<32x8xf32> -> vector<32x8xf32>
    %c288_57 = arith.constant 288 : index
    %c0_58 = arith.constant 0 : index
    %115 = vector.load %arg3[%c288_57, %c0_58] : memref<320x1xf32, #tpu.memory_space<vmem>>, vector<32x1xf32>
    %116 = vector.broadcast %115 : vector<32x1xf32> to vector<32x8xf32>
    %117 = arith.addf %114, %116 : vector<32x8xf32>
    %cst_59 = arith.constant 0.000000e+00 : f32
    %118 = vector.broadcast %cst_59 : f32 to vector<32x8xf32>
    %119 = arith.maximumf %117, %118 : vector<32x8xf32>
    %120 = vector.extract_strided_slice %119 {offsets = [0, 0], sizes = [32, 4], strides = [1, 1]} : vector<32x8xf32> to vector<32x4xf32>
    %c0_60 = arith.constant 0 : index
    %c0_61 = arith.constant 0 : index
    %c0_62 = arith.constant 0 : index
    %121 = vector.load %arg5[%c0_60, %c0_61, %c0_62] : memref<2x32x4xf32, #tpu.memory_space<vmem>>, vector<1x32x4xf32>
    %122 = vector.shape_cast %121 : vector<1x32x4xf32> to vector<32x4xf32>
    %123 = vector.shape_cast %120 : vector<32x4xf32> to vector<1x32x4xf32>
    tpu.vector_store %arg5[%c0_60, %c0_61, %c0_62], %123 {strides = array<i32>} : memref<2x32x4xf32, #tpu.memory_space<vmem>>, vector<1x32x4xf32>,
    %124 = vector.extract_strided_slice %119 {offsets = [0, 4], sizes = [32, 4], strides = [1, 1]} : vector<32x8xf32> to vector<32x4xf32>
    %c1_63 = arith.constant 1 : index
    %c0_64 = arith.constant 0 : index
    %c0_65 = arith.constant 0 : index
    %125 = vector.load %arg5[%c1_63, %c0_64, %c0_65] : memref<2x32x4xf32, #tpu.memory_space<vmem>>, vector<1x32x4xf32>
    %126 = vector.shape_cast %125 : vector<1x32x4xf32> to vector<32x4xf32>
    %127 = vector.shape_cast %124 : vector<32x4xf32> to vector<1x32x4xf32>
    tpu.vector_store %arg5[%c1_63, %c0_64, %c0_65], %127 {strides = array<i32>} : memref<2x32x4xf32, #tpu.memory_space<vmem>>, vector<1x32x4xf32>,
    return
  }
}

</mosaic_0001>

<bundles_post_ra>
// kernel: geometry_transformer_forward.1
= control target key start
LH: loop header
LB: loop body
LE: loop exit
PB: predicated region body
PF: predicated region fallthrough
CT: control target
= control target key end

     0   :  { %vm197_vm0 = vcmask 31744   ;;  %v3626_v29 = vmov 0   ;;  %s5021_s0 = inlined_call_operand.vmem [shape: f32[256,4], index: 0, kind: input, shape index: {}]   ;;  %s5022_s1 = inlined_call_operand.vmem [shape: f32[1024,4], index: 1, kind: input, shape index: {}]   ;;  %s5023_s2 = inlined_call_operand.vmem [shape: bf16[320,128], index: 2, kind: input, shape index: {}]   ;;  %s5024_s3 = inlined_call_operand.vmem [shape: f32[320,1], index: 3, kind: input, shape index: {}]   ;;  %s5025_s4 = inlined_call_operand.hbm [shape: f32[2,32,128], index: 4, kind: output, shape index: {0}]   ;;  %s5026_s5 = inlined_call_operand.vmem [shape: f32[2,32,4], index: 5, kind: output, shape index: {1}]  }
   0x1   :  { %v37_v0 = vld [vmem:[%s5021_s0 + $0x80] sm:$0xff]  ;;  %v38_v1 = vld [vmem:[%s5021_s0 + $0x88] sm:$0xff]  ;;  %vm3672_vm1 = vmpackc.low %vm197_vm0, %vm197_vm0  ;;  %3582 = vset.pattern.permute.xlu0 %v3626_v29  ;;  %3583 = vset.pattern.permute.xlu1 %v3626_v29 }
   0x2   :  { %v69_v2 = vld [vmem:[%s5022_s1 + $0x80] sm:$0xff]  ;;  %v3337_v3 = vpack.c.bf16 %v38_v1, %v37_v0  ;;  %v70_v5 = vld [vmem:[%s5022_s1 + $0x88] sm:$0xff]  ;;  %v39_v13 = vld [vmem:[%s5021_s0 + $0x90] sm:$0xff] }
   0x3   :  { %v21_v6 = vld [vmem:[%s5021_s0] sm:$0xff]  ;;  %v3385_v7 = vpack.c.bf16 %v70_v5, %v69_v2  ;;  %v22_v8 = vld [vmem:[%s5021_s0 + $0x8] sm:$0xff]  ;;  %v40_v14 = vld [vmem:[%s5021_s0 + $0x98] sm:$0xff] }
   0x4   :  { %v53_v9 = vld [vmem:[%s5022_s1] sm:$0xff]  ;;  %v54_v10 = vld [vmem:[%s5022_s1 + $0x8] sm:$0xff]  ;;  %3339 = vmatprep.subr.msk.bf16.mxu0 %vm3672_vm1, %v3337_v3  ;;  %v3340_v11 = vpack.c.bf16 %v22_v8, %v21_v6  ;;  %v71_v15 = vld [vmem:[%s5022_s1 + $0x90] sm:$0xff]  ;;  %v3343_v16 = vpack.c.bf16 %v40_v14, %v39_v13 }
   0x5   :  { %v3388_v12 = vpack.c.bf16 %v54_v10, %v53_v9  ;;  %3387 = vmatprep.subr.msk.bf16.mxu1 %vm3672_vm1, %v3385_v7  ;;  %v72_v17 = vld [vmem:[%s5022_s1 + $0x98] sm:$0xff]  ;;  %v23_v19 = vld [vmem:[%s5021_s0 + $0x10] sm:$0xff]  ;;  %v41_v23 = vld [vmem:[%s5021_s0 + $0xa0] sm:$0xff] }
   0x6   :  { %3342 = vmatpush3.bf16.xpose.msk.msra.mxu0 %vm3672_vm1, %v3340_v11  ;;  %v3391_v18 = vpack.c.bf16 %v72_v17, %v71_v15  ;;  %v24_v20 = vld [vmem:[%s5021_s0 + $0x18] sm:$0xff]  ;;  %v55_v21 = vld [vmem:[%s5022_s1 + $0x10] sm:$0xff]  ;;  %v42_v24 = vld [vmem:[%s5021_s0 + $0xa8] sm:$0xff] }
   0x7   :  { %3390 = vmatpush3.bf16.xpose.msk.msra.mxu1 %vm3672_vm1, %v3388_v12  ;;  %3345 = vmatprep.subr.msk.bf16.mxu0 %vm3672_vm1, %v3343_v16  ;;  %v56_v22 = vld [vmem:[%s5022_s1 + $0x18] sm:$0xff]  ;;  %v73_v25 = vld [vmem:[%s5022_s1 + $0xa0] sm:$0xff]  ;;  %v74_v26 = vld [vmem:[%s5022_s1 + $0xa8] sm:$0xff]  ;;  %v3346_v27 = vpack.c.bf16 %v24_v20, %v23_v19  ;;  %v3349_v30 = vpack.c.bf16 %v42_v24, %v41_v23 }
   0x8   :  { %3393 = vmatprep.subr.msk.bf16.mxu1 %vm3672_vm1, %v3391_v18  ;;  %v3394_v28 = vpack.c.bf16 %v56_v22, %v55_v21  ;;  %v3397_v31 = vpack.c.bf16 %v74_v26, %v73_v25  ;;  %v25_v32 = vld [vmem:[%s5021_s0 + $0x20] sm:$0xff]  ;;  %v26_v33 = vld [vmem:[%s5021_s0 + $0x28] sm:$0xff]  ;;  %v43_v36 = vld [vmem:[%s5021_s0 + $0xb0] sm:$0xff] }
   0x9   :  { %v57_v34 = vld [vmem:[%s5022_s1 + $0x20] sm:$0xff]  ;;  %v58_v35 = vld [vmem:[%s5022_s1 + $0x28] sm:$0xff]  ;;  %v44_v37 = vld [vmem:[%s5021_s0 + $0xb8] sm:$0xff]  ;;  %v3352_v40 = vpack.c.bf16 %v26_v33, %v25_v32 }
   0xa   :  { %v75_v38 = vld [vmem:[%s5022_s1 + $0xb0] sm:$0xff]  ;;  %v76_v39 = vld [vmem:[%s5022_s1 + $0xb8] sm:$0xff]  ;;  %v3400_v41 = vpack.c.bf16 %v58_v35, %v57_v34  ;;  %v3355_v42 = vpack.c.bf16 %v44_v37, %v43_v36  ;;  %v3789_v47 = vld [vmem:[%s5023_s2] sm:$0xff]  }
   0xb   :  { %v3403_v43 = vpack.c.bf16 %v76_v39, %v75_v38  ;;  %v27_v44 = vld [vmem:[%s5021_s0 + $0x30] sm:$0xff]  ;;  %v28_v45 = vld [vmem:[%s5021_s0 + $0x38] sm:$0xff]  ;;  %v45_v49 = vld [vmem:[%s5021_s0 + $0xc0] sm:$0xff]  ;;  %v3126_v50 = vunpack.c.l.bf16 %v3789_v47 }
   0xc   :  { %v59_v46 = vld [vmem:[%s5022_s1 + $0x30] sm:$0xff]  ;;  %v60_v48 = vld [vmem:[%s5022_s1 + $0x38] sm:$0xff]  ;;  %v3805_v51 = vld [vmem:[%s5023_s2 + $0x8] sm:$0xff]   ;;  %v3358_v56 = vpack.c.bf16 %v28_v45, %v27_v44 }
   0xd   :  { %v46_v52 = vld [vmem:[%s5021_s0 + $0xc8] sm:$0xff]  ;;  %v77_v53 = vld [vmem:[%s5022_s1 + $0xc0] sm:$0xff]  ;;  %v3817_v55 = vunpack.c.l.bf16 %v3805_v51  ;;  %3165 = vmatprep.mubr.msk.f32.mxu0 %vm197_vm0, %v3126_v50  ;;  %v3406_v57 = vpack.c.bf16 %v60_v48, %v59_v46  ;;  %v47_v0 = vld [vmem:[%s5021_s0 + $0xd0] sm:$0xff] }
   0xe   :  { %3348 = vmatpush3.bf16.xpose.msk.msra.mxu0 %vm3672_vm1, %v3346_v27  ;;  %v78_v54 = vld [vmem:[%s5022_s1 + $0xc8] sm:$0xff]  ;;  %v3361_v58 = vpack.c.bf16 %v46_v52, %v45_v49  ;;  %v29_v60 = vld [vmem:[%s5021_s0 + $0x40] sm:$0xff]  ;;  %v48_v1 = vld [vmem:[%s5021_s0 + $0xd8] sm:$0xff] }
   0xf   :  { %3396 = vmatpush3.bf16.xpose.msk.msra.mxu1 %vm3672_vm1, %v3394_v28  ;;  %3351 = vmatprep.subr.msk.bf16.mxu0 %vm3672_vm1, %v3349_v30  ;;  %v3409_v59 = vpack.c.bf16 %v78_v54, %v77_v53  ;;  %v30_v61 = vld [vmem:[%s5021_s0 + $0x48] sm:$0xff]  ;;  %v61_v62 = vld [vmem:[%s5022_s1 + $0x40] sm:$0xff]  ;;  %v79_v2 = vld [vmem:[%s5022_s1 + $0xd0] sm:$0xff]  ;;  %v3367_v7 = vpack.c.bf16 %v48_v1, %v47_v0 }
  0x10   :  { %3399 = vmatprep.subr.msk.bf16.mxu1 %vm3672_vm1, %v3397_v31  ;;  %3201 = vmatprep.mubr.msk.f32.mxu1 %vm197_vm0, %v3817_v55  ;;  %v62_v63 = vld [vmem:[%s5022_s1 + $0x48] sm:$0xff]  ;;  %v80_v3 = vld [vmem:[%s5022_s1 + $0xd8] sm:$0xff]  ;;  %v3364_v5 = vpack.c.bf16 %v30_v61, %v29_v60  ;;  %v31_v9 = vld [vmem:[%s5021_s0 + $0x50] sm:$0xff] }
  0x11   :  { %v3412_v6 = vpack.c.bf16 %v62_v63, %v61_v62  ;;  %v3415_v8 = vpack.c.bf16 %v80_v3, %v79_v2  ;;  %v32_v10 = vld [vmem:[%s5021_s0 + $0x58] sm:$0xff]  ;;  %v63_v11 = vld [vmem:[%s5022_s1 + $0x50] sm:$0xff]  ;;  %v49_v13 = vld [vmem:[%s5021_s0 + $0xe0] sm:$0xff] }
  0x12   :  { %v64_v12 = vld [vmem:[%s5022_s1 + $0x58] sm:$0xff]  ;;  %v50_v14 = vld [vmem:[%s5021_s0 + $0xe8] sm:$0xff]  ;;  %v81_v15 = vld [vmem:[%s5022_s1 + $0xe0] sm:$0xff]  ;;  %v3370_v17 = vpack.c.bf16 %v32_v10, %v31_v9  ;;  %v4016_v10 = vunpack.c.h.bf16 %v3805_v51 }
  0x13   :  { %v82_v16 = vld [vmem:[%s5022_s1 + $0xe8] sm:$0xff]  ;;  %v3418_v18 = vpack.c.bf16 %v64_v12, %v63_v11  ;;  %v3373_v19 = vpack.c.bf16 %v50_v14, %v49_v13  ;;  %v33_v21 = vld [vmem:[%s5021_s0 + $0x60] sm:$0xff]  ;;  %v51_v26 = vld [vmem:[%s5021_s0 + $0xf0] sm:$0xff] }
  0x14   :  { %v3421_v20 = vpack.c.bf16 %v82_v16, %v81_v15  ;;  %v34_v22 = vld [vmem:[%s5021_s0 + $0x68] sm:$0xff]  ;;  %v185_v23 = vld [vmem:[%s5024_s3] sm:$0xff]  ;;  %v52_v27 = vld [vmem:[%s5021_s0 + $0xf8] sm:$0xff] }
  0x15   :  { %v65_v24 = vld [vmem:[%s5022_s1 + $0x60] sm:$0xff]  ;;  %v66_v25 = vld [vmem:[%s5022_s1 + $0x68] sm:$0xff]  ;;  %v83_v28 = vld [vmem:[%s5022_s1 + $0xf0] sm:$0xff]  ;;  %189 = vperm.xlu0 %3582, %v185_v23   ;;  %v3376_v32 = vpack.c.bf16 %v34_v22, %v33_v21  ;;  %v3379_v34 = vpack.c.bf16 %v52_v27, %v51_v26 }
  0x16   :  { %3354 = vmatpush3.bf16.xpose.msk.msra.mxu0 %vm3672_vm1, %v3352_v40  ;;  %v84_v30 = vld [vmem:[%s5022_s1 + $0xf8] sm:$0xff]  ;;  %v186_v31 = vld [vmem:[%s5024_s3 + $0x8] sm:$0xff]  ;;  %v3424_v33 = vpack.c.bf16 %v66_v25, %v65_v24  ;;  %v1129_v36 = vld [vmem:[%s5024_s3 + $0x20] sm:$0xff] }
  0x17   :  { %3402 = vmatpush3.bf16.xpose.msk.msra.mxu1 %vm3672_vm1, %v3400_v41  ;;  %3357 = vmatprep.subr.msk.bf16.mxu0 %vm3672_vm1, %v3355_v42  ;;  %v3427_v35 = vpack.c.bf16 %v84_v30, %v83_v28  ;;  %v35_v37 = vld [vmem:[%s5021_s0 + $0x70] sm:$0xff]  ;;  %v36_v38 = vld [vmem:[%s5021_s0 + $0x78] sm:$0xff]  ;;  %v101_v42 = vld [vmem:[%s5022_s1 + $0x180] sm:$0xff] }
  0x18   :  { %3405 = vmatprep.subr.msk.bf16.mxu1 %vm3672_vm1, %v3403_v43  ;;  %v385_v39 = vld [vmem:[%s5024_s3 + $0x10] sm:$0xff]  ;;  %v68_v41 = vld [vmem:[%s5022_s1 + $0x78] sm:$0xff]  ;;  %v102_v43 = vld [vmem:[%s5022_s1 + $0x188] sm:$0xff]  ;;  %v3382_v49 = vpack.c.bf16 %v36_v38, %v35_v37 }
  0x19   :  { %194 = vperm.xlu0 %3582, %v186_v31   ;;  %v67_v40 = vld [vmem:[%s5022_s1 + $0x70] sm:$0xff]  ;;  %v133_v44 = vld [vmem:[%s5022_s1 + $0x280] sm:$0xff]  ;;  %v134_v45 = vld [vmem:[%s5022_s1 + $0x288] sm:$0xff]  ;;  %389 = vperm.xlu1 %3583, %v385_v39   ;;  %v3433_v53 = vpack.c.bf16 %v102_v43, %v101_v42 }
  0x1a   :  { %v1131_v46 = vld [vmem:[%s5024_s3 + $0x30] sm:$0xff]  ;;  %v386_v48 = vld [vmem:[%s5024_s3 + $0x18] sm:$0xff]  ;;  %v3430_v52 = vpack.c.bf16 %v68_v41, %v67_v40  ;;  %v3481_v54 = vpack.c.bf16 %v134_v45, %v133_v44  ;;  %v117_v60 = vld [vmem:[%s5022_s1 + $0x200] sm:$0xff] }
  0x1b   :  { %v118_v61 = vld [vmem:[%s5022_s1 + $0x208] sm:$0xff]  ;;  %v103_v62 = vld [vmem:[%s5022_s1 + $0x190] sm:$0xff]  ;;  %v104_v63 = vld [vmem:[%s5022_s1 + $0x198] sm:$0xff] }
  0x1c   :  { %v135_v0 = vld [vmem:[%s5022_s1 + $0x290] sm:$0xff]  ;;  %v136_v1 = vld [vmem:[%s5022_s1 + $0x298] sm:$0xff]  ;;  %v106_v13 = vld [vmem:[%s5022_s1 + $0x1a8] sm:$0xff] }
  0x1d   :  { %1139 = vperm.xlu0 %3582, %v1129_v36   ;;  %394 = vperm.xlu1 %3583, %v386_v48   ;;  %v1135_v2 = vld [vmem:[%s5024_s3 + $0x50] sm:$0xff]  ;;  %v1132_v3 = vld [vmem:[%s5024_s3 + $0x38] sm:$0xff]  ;;  %v3487_v9 = vpack.c.bf16 %v136_v1, %v135_v0  ;;  %v137_v14 = vld [vmem:[%s5022_s1 + $0x2a0] sm:$0xff] }
  0x1e   :  { %3360 = vmatpush3.bf16.xpose.msk.msra.mxu0 %vm3672_vm1, %v3358_v56  ;;  %v1133_v56 = vld [vmem:[%s5024_s3 + $0x40] sm:$0xff]  ;;  %v87_v11 = vld [vmem:[%s5022_s1 + $0x110] sm:$0xff]  ;;  %v88_v12 = vld [vmem:[%s5022_s1 + $0x118] sm:$0xff] }
  0x1f   :  { %3408 = vmatpush3.bf16.xpose.msk.msra.mxu1 %vm3672_vm1, %v3406_v57  ;;  %3363 = vmatprep.subr.msk.bf16.mxu0 %vm3672_vm1, %v3361_v58  ;;  %v1130_v57 = vld [vmem:[%s5024_s3 + $0x28] sm:$0xff]  ;;  %v85_v58 = vld [vmem:[%s5022_s1 + $0x100] sm:$0xff]  ;;  %v119_v51 = vld [vmem:[%s5022_s1 + $0x210] sm:$0xff] }
  0x20   :  { %3411 = vmatprep.subr.msk.bf16.mxu1 %vm3672_vm1, %v3409_v59  ;;  %v86_v59 = vld [vmem:[%s5022_s1 + $0x108] sm:$0xff]  ;;  %v1715_v16 = vld [vmem:[%s5024_s3 + $0xa0] sm:$0xff] }
  0x21   :  { %1149 = vperm.xlu0 %3582, %v1131_v46   ;;  %1144 = vperm.xlu1 %3583, %v1130_v57   ;;  %v138_v15 = vld [vmem:[%s5022_s1 + $0x2a8] sm:$0xff] }
  0x22   :  { %v3493_v21 = vpack.c.bf16 %v138_v15, %v137_v14 }
  0x25   :  { %1159 = vperm.xlu0 %3582, %v1133_v56   ;;  %1154 = vperm.xlu1 %3583, %v1132_v3  }
  0x26   :  { %3366 = vmatpush3.bf16.xpose.msk.msra.mxu0 %vm3672_vm1, %v3364_v5  ;;  %v3436_v5 = vpack.c.bf16 %v86_v59, %v85_v58 }
  0x27   :  { %3414 = vmatpush3.bf16.xpose.msk.msra.mxu1 %vm3672_vm1, %v3412_v6  ;;  %3369 = vmatprep.subr.msk.bf16.mxu0 %vm3672_vm1, %v3367_v7  ;;  %v3484_v6 = vpack.c.bf16 %v118_v61, %v117_v60  ;;  %v3127_v7 = vunpack.c.h.bf16 %v3789_v47  ;;  %v120_v47 = vld [vmem:[%s5022_s1 + $0x218] sm:$0xff] }
  0x28   :  { %3417 = vmatprep.subr.msk.bf16.mxu1 %vm3672_vm1, %v3415_v8  ;;  %v3439_v8 = vpack.c.bf16 %v104_v63, %v103_v62 }
  0x29   :  { %1169 = vperm.xlu0 %3582, %v1135_v2  }
  0x2d   :  { %1761 = vperm.xlu0 %3582, %v1715_v16  }
  0x2e   :  { %3372 = vmatpush3.bf16.xpose.msk.msra.mxu0 %vm3672_vm1, %v3370_v17  ;;  %v1134_v17 = vld [vmem:[%s5024_s3 + $0x48] sm:$0xff] }
  0x2f   :  { %3420 = vmatpush3.bf16.xpose.msk.msra.mxu1 %vm3672_vm1, %v3418_v18  ;;  %3375 = vmatprep.subr.msk.bf16.mxu0 %vm3672_vm1, %v3373_v19  ;;  %v3442_v18 = vpack.c.bf16 %v88_v12, %v87_v11  ;;  %v3490_v19 = vpack.c.bf16 %v120_v47, %v119_v51 }
  0x30   :  { %3423 = vmatprep.subr.msk.bf16.mxu1 %vm3672_vm1, %v3421_v20  ;;  %1164 = vperm.xlu1 %3583, %v1134_v17  }
  0x36   :  { %3378 = vmatpush3.bf16.xpose.msk.msra.mxu0 %vm3672_vm1, %v3376_v32 }
  0x37   :  { %3426 = vmatpush3.bf16.xpose.msk.msra.mxu1 %vm3672_vm1, %v3424_v33  ;;  %3381 = vmatprep.subr.msk.bf16.mxu0 %vm3672_vm1, %v3379_v34 }
  0x38   :  { %3429 = vmatprep.subr.msk.bf16.mxu1 %vm3672_vm1, %v3427_v35 }
  0x3e   :  { %3384 = vmatpush3.bf16.xpose.msk.msra.mxu0 %vm3672_vm1, %v3382_v49 }
  0x3f   :  { %3432 = vmatpush3.bf16.xpose.msk.msra.mxu1 %vm3672_vm1, %v3430_v52  ;;  %3435 = vmatprep.subr.msk.bf16.mxu0 %vm3672_vm1, %v3433_v53 }
  0x40   :  { %3483 = vmatprep.subr.msk.bf16.mxu1 %vm3672_vm1, %v3481_v54 }
  0x45   :  { %3166 = vmatmul.mubr.msk.f32.vlgmr.msra.gmra.mrb[0].mxu0 %vm197_vm0, %v3126_v50  ;;  %v105_v50 = vld [vmem:[%s5022_s1 + $0x1a0] sm:$0xff] }
  0x46   :  { %3202 = vmatmul.mubr.msk.f32.vlgmr.msra.gmra.mrb[0].mxu1 %vm197_vm0, %v3817_v55  ;;  %3438 = vmatpush3.bf16.xpose.msk.msra.mxu0 %vm3672_vm1, %v3436_v5  ;;  %v3445_v20 = vpack.c.bf16 %v106_v13, %v105_v50 }
  0x47   :  { %3486 = vmatpush3.bf16.xpose.msk.msra.mxu1 %vm3672_vm1, %v3484_v6  ;;  %3167 = vmatprep.mubr.msk.f32.mxu0 %vm197_vm0, %v3127_v7 }
  0x48   :  { %3441 = vmatprep.subr.msk.bf16.mxu0 %vm3672_vm1, %v3439_v8  ;;  %3489 = vmatprep.subr.msk.bf16.mxu1 %vm3672_vm1, %v3487_v9 }
  0x49   :  { %3203 = vmatprep.mubr.msk.f32.mxu1 %vm197_vm0, %v4016_v10  ;;  %3168 = vmatmul.mubr.msk.f32.gmra.mrb[2].mxu0 %vm197_vm0, %v3127_v7 }
  0x4a   :  { %3204 = vmatmul.mubr.msk.f32.gmra.mrb[2].mxu1 %vm197_vm0, %v4016_v10  ;;  %3237 = vmatprep.mubr.msk.f32.mxu0 %vm197_vm0, %v3817_v55 }
  0x4b   :  { %3273 = vmatprep.mubr.msk.f32.mxu1 %vm197_vm0, %v3817_v55 }
  0x4c   :  { %11 = vsyncpa [#allocation3], 0  ;;  %v1717_v22 = vld [vmem:[%s5024_s3 + $0xb0] sm:$0xff]  ;;  %v1136_v23 = vld [vmem:[%s5024_s3 + $0x58] sm:$0xff]  ;;  %vm1197_vm2 = vcmask 261120   ;;  %vm1809_vm3 = vcmask 523264  }
  0x4d   :  { %v89_v24 = vld [vmem:[%s5022_s1 + $0x120] sm:$0xff]  ;;  %v90_v25 = vld [vmem:[%s5022_s1 + $0x128] sm:$0xff]  ;;  %v107_v28 = vld [vmem:[%s5022_s1 + $0x1b0] sm:$0xff]  ;;  %1771 = vperm.xlu0 %3582, %v1717_v22   ;;  %1174 = vperm.xlu1 %3583, %v1136_v23   ;;  %vm2597_vm4 = vcmask 7168   ;;  %vm2602_vm5 = vcmask 15360   ;;  %vm2607_vm6 = vcmask 23552  }
  0x4e   :  { %3444 = vmatpush3.bf16.xpose.msk.msra.mxu0 %vm3672_vm1, %v3442_v18  ;;  %v121_v26 = vld [vmem:[%s5022_s1 + $0x220] sm:$0xff]  ;;  %v122_v27 = vld [vmem:[%s5022_s1 + $0x228] sm:$0xff]  ;;  %v108_v30 = vld [vmem:[%s5022_s1 + $0x1b8] sm:$0xff]  ;;  %v3448_v35 = vpack.c.bf16 %v90_v25, %v89_v24  ;;  %vm2616_vm7 = vcmask 39936   ;;  %vm2621_vm8 = vcmask 48128   ;;  %vm2626_vm9 = vcmask 56320  }
  0x4f   :  { %3492 = vmatpush3.bf16.xpose.msk.msra.mxu1 %vm3672_vm1, %v3490_v19  ;;  %3447 = vmatprep.subr.msk.bf16.mxu0 %vm3672_vm1, %v3445_v20  ;;  %v139_v31 = vld [vmem:[%s5022_s1 + $0x2b0] sm:$0xff]  ;;  %v140_v32 = vld [vmem:[%s5022_s1 + $0x2b8] sm:$0xff]  ;;  %v1707_v33 = vld [vmem:[%s5024_s3 + $0x60] sm:$0xff]  ;;  %v3496_v36 = vpack.c.bf16 %v122_v27, %v121_v26  ;;  %v3451_v37 = vpack.c.bf16 %v108_v30, %v107_v28  ;;  %vm2347_vm10 = vcmask 785408   ;;  %s3627_s20 = smov 124   ;;  %s3628_s25 = smov [#allocation2]  }
  0x50   :  { %3495 = vmatprep.subr.msk.bf16.mxu1 %vm3672_vm1, %v3493_v21  ;;  %v1716_v34 = vld [vmem:[%s5024_s3 + $0xa8] sm:$0xff]  ;;  %v3499_v38 = vpack.c.bf16 %v140_v32, %v139_v31  ;;  %v1709_v39 = vld [vmem:[%s5024_s3 + $0x70] sm:$0xff]  ;;  %v1718_v40 = vld [vmem:[%s5024_s3 + $0xb8] sm:$0xff]  ;;  %s2859_s26 = sshll.u32 %s3628_s25, 4  ;;  %s2860_s26 = int_to_ptr.vmem [resolvable:$true] %s2859_s26 }
  0x51   :  { %1721 = vperm.xlu0 %3582, %v1707_v33   ;;  %1766 = vperm.xlu1 %3583, %v1716_v34   ;;  %v91_v41 = vld [vmem:[%s5022_s1 + $0x130] sm:$0xff]  ;;  %v92_v42 = vld [vmem:[%s5022_s1 + $0x138] sm:$0xff]  ;;  %v109_v45 = vld [vmem:[%s5022_s1 + $0x1c0] sm:$0xff]  ;;  %s3602_s27 = scalar_lea.vmem %s2860_s26, 1024  ;;  %p3607_p1 = scmp.lt.s32.totalorder %s2860_s26, %s2860_s26 }
  0x52   :  { %v123_v43 = vld [vmem:[%s5022_s1 + $0x230] sm:$0xff]  ;;  %v124_v44 = vld [vmem:[%s5022_s1 + $0x238] sm:$0xff]  ;;  %v110_v46 = vld [vmem:[%s5022_s1 + $0x1c8] sm:$0xff]  ;;  %v3454_v54 = vpack.c.bf16 %v92_v42, %v91_v41  ;;  %p3603_p0 = scmp.ne.s32.totalorder %s2860_s26, %s3602_s27  ;;  %p3608_p2 = scmp.lt.s32.totalorder %s3602_s27, %s3602_s27 }
  0x53   :  { %v141_v48 = vld [vmem:[%s5022_s1 + $0x2c0] sm:$0xff]  ;;  %v142_v49 = vld [vmem:[%s5022_s1 + $0x2c8] sm:$0xff]  ;;  %v3502_v56 = vpack.c.bf16 %v124_v44, %v123_v43  ;;  %v3457_v57 = vpack.c.bf16 %v110_v46, %v109_v45  ;;  %v1713_v59 = vld [vmem:[%s5024_s3 + $0x90] sm:$0xff] }
  0x54   :  { %v1711_v52 = vld [vmem:[%s5024_s3 + $0x80] sm:$0xff]  ;;  %v1708_v53 = vld [vmem:[%s5024_s3 + $0x68] sm:$0xff]  ;;  %v3505_v58 = vpack.c.bf16 %v142_v49, %v141_v48  ;;  %v1710_v60 = vld [vmem:[%s5024_s3 + $0x78] sm:$0xff]  ;;  %p3609_p3 = por %p3608_p2, %p3607_p1 }
  0x55   :  { %1731 = vperm.xlu0 %3582, %v1709_v39   ;;  %1776 = vperm.xlu1 %3583, %v1718_v40   ;;  %v93_v61 = vld [vmem:[%s5022_s1 + $0x140] sm:$0xff]  ;;  %v94_v62 = vld [vmem:[%s5022_s1 + $0x148] sm:$0xff]  ;;  %v111_v1 = vld [vmem:[%s5022_s1 + $0x1d0] sm:$0xff] }
  0x56   :  { %3450 = vmatpush3.bf16.xpose.msk.msra.mxu0 %vm3672_vm1, %v3448_v35  ;;  %v125_v63 = vld [vmem:[%s5022_s1 + $0x240] sm:$0xff]  ;;  %v126_v0 = vld [vmem:[%s5022_s1 + $0x248] sm:$0xff]  ;;  %v112_v2 = vld [vmem:[%s5022_s1 + $0x1d8] sm:$0xff]  ;;  %v3460_v7 = vpack.c.bf16 %v94_v62, %v93_v61  ;;  %p3610_p4 = pnand %p3609_p3, %p3603_p0 }
  0x57   :  { %3498 = vmatpush3.bf16.xpose.msk.msra.mxu1 %vm3672_vm1, %v3496_v36  ;;  %3453 = vmatprep.subr.msk.bf16.mxu0 %vm3672_vm1, %v3451_v37  ;;  %v143_v3 = vld [vmem:[%s5022_s1 + $0x2d0] sm:$0xff]  ;;  %v144_v5 = vld [vmem:[%s5022_s1 + $0x2d8] sm:$0xff]  ;;  %v1712_v6 = vld [vmem:[%s5024_s3 + $0x88] sm:$0xff]  ;;  %v3508_v8 = vpack.c.bf16 %v126_v0, %v125_v63  ;;  %v3463_v9 = vpack.c.bf16 %v112_v2, %v111_v1 }
  0x58   :  { %3501 = vmatprep.subr.msk.bf16.mxu1 %vm3672_vm1, %v3499_v38  ;;  %v3511_v11 = vpack.c.bf16 %v144_v5, %v143_v3  ;;  %v1714_v12 = vld [vmem:[%s5024_s3 + $0x98] sm:$0xff]  ;;  %v95_v51 = vld [vmem:[%s5022_s1 + $0x150] sm:$0xff]  ;;  %v113_v14 = vld [vmem:[%s5022_s1 + $0x1e0] sm:$0xff] }
  0x59   :  { %1741 = vperm.xlu0 %3582, %v1711_v52   ;;  %1726 = vperm.xlu1 %3583, %v1708_v53   ;;  %v96_v47 = vld [vmem:[%s5022_s1 + $0x158] sm:$0xff]  ;;  %v127_v50 = vld [vmem:[%s5022_s1 + $0x250] sm:$0xff]  ;;  %v114_v15 = vld [vmem:[%s5022_s1 + $0x1e8] sm:$0xff] }
  0x5a   :  { %v128_v13 = vld [vmem:[%s5022_s1 + $0x258] sm:$0xff]  ;;  %v145_v16 = vld [vmem:[%s5022_s1 + $0x2e0] sm:$0xff]  ;;  %v146_v17 = vld [vmem:[%s5022_s1 + $0x2e8] sm:$0xff]  ;;  %v3466_v18 = vpack.c.bf16 %v96_v47, %v95_v51  ;;  %v3469_v20 = vpack.c.bf16 %v114_v15, %v113_v14 }
  0x5b   :  { %v3514_v19 = vpack.c.bf16 %v128_v13, %v127_v50  ;;  %v3517_v21 = vpack.c.bf16 %v146_v17, %v145_v16  ;;  %v97_v22 = vld [vmem:[%s5022_s1 + $0x160] sm:$0xff]  ;;  %v98_v23 = vld [vmem:[%s5022_s1 + $0x168] sm:$0xff]  ;;  %v115_v26 = vld [vmem:[%s5022_s1 + $0x1f0] sm:$0xff] }
  0x5c   :  { %v129_v24 = vld [vmem:[%s5022_s1 + $0x260] sm:$0xff]  ;;  %v130_v25 = vld [vmem:[%s5022_s1 + $0x268] sm:$0xff]  ;;  %v116_v27 = vld [vmem:[%s5022_s1 + $0x1f8] sm:$0xff]  ;;  %v3472_v31 = vpack.c.bf16 %v98_v23, %v97_v22 }
  0x5d   :  { %1751 = vperm.xlu0 %3582, %v1713_v59   ;;  %1736 = vperm.xlu1 %3583, %v1710_v60   ;;  %v147_v28 = vld [vmem:[%s5022_s1 + $0x2f0] sm:$0xff]  ;;  %v148_v30 = vld [vmem:[%s5022_s1 + $0x2f8] sm:$0xff]  ;;  %v3520_v32 = vpack.c.bf16 %v130_v25, %v129_v24  ;;  %v3475_v33 = vpack.c.bf16 %v116_v27, %v115_v26  ;;  %v165_v39 = vld [vmem:[%s5022_s1 + $0x380] sm:$0xff] }
  0x5e   :  { %3456 = vmatpush3.bf16.xpose.msk.msra.mxu0 %vm3672_vm1, %v3454_v54  ;;  %v3523_v34 = vpack.c.bf16 %v148_v30, %v147_v28  ;;  %v99_v35 = vld [vmem:[%s5022_s1 + $0x170] sm:$0xff]  ;;  %v100_v36 = vld [vmem:[%s5022_s1 + $0x178] sm:$0xff]  ;;  %v166_v40 = vld [vmem:[%s5022_s1 + $0x388] sm:$0xff] }
  0x5f   :  { %3504 = vmatpush3.bf16.xpose.msk.msra.mxu1 %vm3672_vm1, %v3502_v56  ;;  %3459 = vmatprep.subr.msk.bf16.mxu0 %vm3672_vm1, %v3457_v57  ;;  %v131_v37 = vld [vmem:[%s5022_s1 + $0x270] sm:$0xff]  ;;  %v132_v38 = vld [vmem:[%s5022_s1 + $0x278] sm:$0xff]  ;;  %v3478_v41 = vpack.c.bf16 %v100_v36, %v99_v35  ;;  %v3529_v43 = vpack.c.bf16 %v166_v40, %v165_v39  ;;  %v149_v44 = vld [vmem:[%s5022_s1 + $0x300] sm:$0xff] }
  0x60   :  { %3507 = vmatprep.subr.msk.bf16.mxu1 %vm3672_vm1, %v3505_v58  ;;  %v3526_v42 = vpack.c.bf16 %v132_v38, %v131_v37  ;;  %v150_v45 = vld [vmem:[%s5022_s1 + $0x308] sm:$0xff]  ;;  %v167_v46 = vld [vmem:[%s5022_s1 + $0x390] sm:$0xff]  ;;  %v168_v48 = vld [vmem:[%s5022_s1 + $0x398] sm:$0xff] }
  0x61   :  { %1746 = vperm.xlu1 %3583, %v1712_v6   ;;  %v3532_v49 = vpack.c.bf16 %v150_v45, %v149_v44  ;;  %v3535_v52 = vpack.c.bf16 %v168_v48, %v167_v46  ;;  %v151_v53 = vld [vmem:[%s5022_s1 + $0x310] sm:$0xff]  ;;  %v152_v54 = vld [vmem:[%s5022_s1 + $0x318] sm:$0xff]  ;;  %v169_v56 = vld [vmem:[%s5022_s1 + $0x3a0] sm:$0xff] }
  0x62   :  { %v170_v57 = vld [vmem:[%s5022_s1 + $0x3a8] sm:$0xff]  ;;  %v3538_v58 = vpack.c.bf16 %v152_v54, %v151_v53  ;;  %v153_v60 = vld [vmem:[%s5022_s1 + $0x320] sm:$0xff]  ;;  %v171_v62 = vld [vmem:[%s5022_s1 + $0x3b0] sm:$0xff] }
  0x63   :  { %v3541_v59 = vpack.c.bf16 %v170_v57, %v169_v56  ;;  %v154_v61 = vld [vmem:[%s5022_s1 + $0x328] sm:$0xff]  ;;  %v172_v63 = vld [vmem:[%s5022_s1 + $0x3b8] sm:$0xff]  ;;  %v155_v2 = vld [vmem:[%s5022_s1 + $0x330] sm:$0xff] }
  0x64   :  { %v3544_v0 = vpack.c.bf16 %v154_v61, %v153_v60  ;;  %v3547_v1 = vpack.c.bf16 %v172_v63, %v171_v62  ;;  %v156_v3 = vld [vmem:[%s5022_s1 + $0x338] sm:$0xff]  ;;  %v173_v5 = vld [vmem:[%s5022_s1 + $0x3c0] sm:$0xff]  ;;  %v174_v6 = vld [vmem:[%s5022_s1 + $0x3c8] sm:$0xff] }
  0x65   :  { %1756 = vperm.xlu1 %3583, %v1714_v12   ;;  %v175_v12 = vld [vmem:[%s5022_s1 + $0x3d0] sm:$0xff]  ;;  %v176_v51 = vld [vmem:[%s5022_s1 + $0x3d8] sm:$0xff]  ;;  %v177_v15 = vld [vmem:[%s5022_s1 + $0x3e0] sm:$0xff] }
  0x66   :  { %3462 = vmatpush3.bf16.xpose.msk.msra.mxu0 %vm3672_vm1, %v3460_v7  ;;  %v3550_v7 = vpack.c.bf16 %v156_v3, %v155_v2  ;;  %v3559_v50 = vpack.c.bf16 %v176_v51, %v175_v12  ;;  %v159_v13 = vld [vmem:[%s5022_s1 + $0x350] sm:$0xff]  ;;  %v160_v14 = vld [vmem:[%s5022_s1 + $0x358] sm:$0xff]  ;;  %v178_v16 = vld [vmem:[%s5022_s1 + $0x3e8] sm:$0xff] }
  0x67   :  { %3510 = vmatpush3.bf16.xpose.msk.msra.mxu1 %vm3672_vm1, %v3508_v8  ;;  %3465 = vmatprep.subr.msk.bf16.mxu0 %vm3672_vm1, %v3463_v9  ;;  %v3553_v8 = vpack.c.bf16 %v174_v6, %v173_v5  ;;  %v157_v9 = vld [vmem:[%s5022_s1 + $0x340] sm:$0xff]  ;;  %v3562_v17 = vpack.c.bf16 %v160_v14, %v159_v13  ;;  %v180_v22 = vld [vmem:[%s5022_s1 + $0x3f8] sm:$0xff]  ;;  %v163_v25 = vld [vmem:[%s5022_s1 + $0x370] sm:$0xff] }
  0x68   :  { %3513 = vmatprep.subr.msk.bf16.mxu1 %vm3672_vm1, %v3511_v11  ;;  %v158_v11 = vld [vmem:[%s5022_s1 + $0x348] sm:$0xff]  ;;  %v164_v26 = vld [vmem:[%s5022_s1 + $0x378] sm:$0xff]  ;;  %v4454_v62 = vld [vmem:[%s5023_s2 + $0x10] sm:$0xff]  }
  0x69   :  { %v3556_v47 = vpack.c.bf16 %v158_v11, %v157_v9  ;;  %v3574_v27 = vpack.c.bf16 %v164_v26, %v163_v25  ;;  %v4464_v63 = vld [vmem:[%s5023_s2 + $0x18] sm:$0xff]  }
  0x6e   :  { %3468 = vmatpush3.bf16.xpose.msk.msra.mxu0 %vm3672_vm1, %v3466_v18  ;;  %v3565_v18 = vpack.c.bf16 %v178_v16, %v177_v15 }
  0x6f   :  { %3516 = vmatpush3.bf16.xpose.msk.msra.mxu1 %vm3672_vm1, %v3514_v19  ;;  %3471 = vmatprep.subr.msk.bf16.mxu0 %vm3672_vm1, %v3469_v20  ;;  %v161_v19 = vld [vmem:[%s5022_s1 + $0x360] sm:$0xff]  ;;  %v162_v20 = vld [vmem:[%s5022_s1 + $0x368] sm:$0xff] }
  0x70   :  { %3519 = vmatprep.subr.msk.bf16.mxu1 %vm3672_vm1, %v3517_v21  ;;  %v179_v21 = vld [vmem:[%s5022_s1 + $0x3f0] sm:$0xff]  ;;  %v3568_v23 = vpack.c.bf16 %v162_v20, %v161_v19 }
  0x71   :  { %v3571_v24 = vpack.c.bf16 %v180_v22, %v179_v21 }
  0x76   :  { %3474 = vmatpush3.bf16.xpose.msk.msra.mxu0 %vm3672_vm1, %v3472_v31 }
  0x77   :  { %3522 = vmatpush3.bf16.xpose.msk.msra.mxu1 %vm3672_vm1, %v3520_v32  ;;  %3477 = vmatprep.subr.msk.bf16.mxu0 %vm3672_vm1, %v3475_v33 }
  0x78   :  { %3525 = vmatprep.subr.msk.bf16.mxu1 %vm3672_vm1, %v3523_v34 }
  0x7e   :  { %3480 = vmatpush3.bf16.xpose.msk.msra.mxu0 %vm3672_vm1, %v3478_v41 }
  0x7f   :  { %3528 = vmatpush3.bf16.xpose.msk.msra.mxu1 %vm3672_vm1, %v3526_v42  ;;  %3531 = vmatprep.subr.msk.bf16.mxu0 %vm3672_vm1, %v3529_v43 }
  0x85   :  { %3238 = vmatmul.mubr.msk.f32.vlgmr.msra.gmra.mrb[4].mxu0 %vm197_vm0, %v3817_v55 }
  0x86   :  { %3274 = vmatmul.mubr.msk.f32.vlgmr.msra.gmra.mrb[4].mxu1 %vm197_vm0, %v3817_v55  ;;  %3534 = vmatpush3.bf16.xpose.msk.msra.mxu0 %vm3672_vm1, %v3532_v49 }
  0x87   :  { %3239 = vmatprep.mubr.msk.f32.mxu0 %vm197_vm0, %v4016_v10  ;;  %3275 = vmatprep.mubr.msk.f32.mxu1 %vm197_vm0, %v4016_v10 }
  0x88   :  { %3537 = vmatprep.subr.msk.bf16.mxu0 %vm3672_vm1, %v3535_v52 }
  0x89   :  { %3240 = vmatmul.mubr.msk.f32.gmra.mrb[6].mxu0 %vm197_vm0, %v4016_v10 }
  0x8a   :  { %3276 = vmatmul.mubr.msk.f32.gmra.mrb[6].mxu1 %vm197_vm0, %v4016_v10  ;;  %3309 = vmatprep.mubr.msk.f32.mxu0 %vm197_vm0, %v3817_v55 }
  0x8b   :  { %1242 = vmatprep.mubr.bf16.mxu1 %v3626_v29 }
  0x8e   :  { %3540 = vmatpush3.bf16.xpose.msk.msra.mxu0 %vm3672_vm1, %v3538_v58 }
  0x8f   :  { %3543 = vmatprep.subr.msk.bf16.mxu0 %vm3672_vm1, %v3541_v59 }
  0x94   :  { %v190_v28 = vpop.permute.xlu0 %189 }
  0x96   :  { %3546 = vmatpush3.bf16.xpose.msk.msra.mxu0 %vm3672_vm1, %v3544_v0  ;;  %v4473_v0 = vld [vmem:[%s5023_s2 + $0x20] sm:$0xff]  }
  0x97   :  { %3549 = vmatprep.subr.msk.bf16.mxu0 %vm3672_vm1, %v3547_v1  ;;  %v4481_v1 = vld [vmem:[%s5023_s2 + $0x28] sm:$0xff]  }
  0x98   :  { %v4443_v30 = vpop.permute.xlu1 %389  ;;  %v195_v35 = vpop.permute.xlu0 %194 }
  0x9c   :  { %v4447_v37 = vpop.permute.xlu1 %394 }
  0x9e   :  { %3552 = vmatpush3.bf16.xpose.msk.msra.mxu0 %vm3672_vm1, %v3550_v7 }
  0x9f   :  { %3555 = vmatprep.subr.msk.bf16.mxu0 %vm3672_vm1, %v3553_v8 }
  0xa6   :  { %3558 = vmatpush3.bf16.xpose.msk.msra.mxu0 %vm3672_vm1, %v3556_v47 }
  0xa7   :  { %3561 = vmatprep.subr.msk.bf16.mxu0 %vm3672_vm1, %v3559_v50 }
  0xae   :  { %3564 = vmatpush3.bf16.xpose.msk.msra.mxu0 %vm3672_vm1, %v3562_v17 }
  0xaf   :  { %3567 = vmatprep.subr.msk.bf16.mxu0 %vm3672_vm1, %v3565_v18 }
  0xb6   :  { %3570 = vmatpush3.bf16.xpose.msk.msra.mxu0 %vm3672_vm1, %v3568_v23 }
  0xb7   :  { %3573 = vmatprep.subr.msk.bf16.mxu0 %vm3672_vm1, %v3571_v24 }
  0xbe   :  { %3576 = vmatpush3.bf16.xpose.msk.msra.mxu0 %vm3672_vm1, %v3574_v27 }
  0xbf   :  { %1356 = vmatprep.subr.bf16.mxu0 %v3626_v29 }
  0xc5   :  { %3310 = vmatmul.mubr.msk.f32.vlgmr.msra.gmra.mrb[8].mxu0 %vm197_vm0, %v3817_v55 }
  0xc6   :  { %3311 = vmatprep.mubr.msk.f32.mxu0 %vm197_vm0, %v4016_v10  ;;  %1357 = vmatpush1.bf16.msra.mxu0 %v3626_v29 }
  0xc9   :  { %3312 = vmatmul.mubr.msk.f32.gmra.mrb[10].mxu0 %vm197_vm0, %v4016_v10 }
  0xca   :  { %1388 = vmatprep.mubr.bf16.mxu0 %v3626_v29 }
 0x118   :  { %v366_v4 = vpop.f32.mrb[0].mxu0 }
 0x119   :  { %v853_v31 = vpop.f32.mrb[0].mxu1  ;;  %v368_v32 = vpop.f32.mrb[1].mxu0  ;;  %v367_v36 = vadd.f32 %v366_v4, %v190_v28 }
 0x11a   :  { %v854_v33 = vadd.f32 %v853_v31, %v4443_v30  ;;  %v855_v34 = vpop.f32.mrb[1].mxu1  ;;  %v369_v38 = vadd.f32 %v368_v32, %v190_v28 }
 0x11b   :  { %v856_v55 = vadd.f32 %v855_v34, %v4443_v30  ;;  %v377_v49 = vmax.f32 %v367_v36, 0.0 }
 0x11c   :  { %v372_v39 = vpop.f32.mrb[2].mxu0  ;;  %v1095_v42 = vmax.f32 %v854_v33, 0.0  ;;  %v378_v54 = vmax.f32 %v369_v38, 0.0 }
 0x11d   :  { %v859_v10 = vpop.f32.mrb[2].mxu1  ;;  %v373_v40 = vadd.f32 %v372_v39, %v195_v35  ;;  %v374_v41 = vpop.f32.mrb[3].mxu0  ;;  %v1096_v46 = vmax.f32 %v856_v55, 0.0 }
 0x11e   :  { %v860_v43 = vadd.f32 %v859_v10, %v4447_v37  ;;  %v861_v44 = vpop.f32.mrb[3].mxu1  ;;  %v375_v45 = vadd.f32 %v374_v41, %v195_v35 }
 0x11f   :  { %v862_v48 = vadd.f32 %v861_v44, %v4447_v37  ;;  %v379_v52 = vmax.f32 %v373_v40, 0.0 }
 0x120   :  { %v1103_v53 = vmax.f32 %v860_v43, 0.0  ;;  %v380_v56 = vmax.f32 %v375_v45, 0.0  ;;  %v4552_v45 = vpop.permute.xlu1 %1144 }
 0x121   :  { %v1104_v57 = vmax.f32 %v862_v48, 0.0  ;;  %v1111_v58 = vpack.c.bf16 %v379_v52, %v377_v49 }
 0x122   :  { %v1113_v59 = vpack.c.bf16 %v1103_v53, %v1095_v42  ;;  %v1112_v60 = vpack.c.bf16 %v380_v56, %v378_v54 }
 0x123   :  { %v1114_v61 = vpack.c.bf16 %v1104_v57, %v1096_v46 }
 0x124   :  { %1210 = vmatprep.subr.bf16.mxu1 %v1112_v60 }
 0x125   :  { %1211 = vmatpush1.bf16.msra.mxu1 %v1111_v58 }
 0x126   :  { %1283 = vmatprep.subr.bf16.mxu1 %v3626_v29 }
 0x128   :  { %3048 = vmatmul.mubr.msk.bf16.vlgmr.msra.gmra.mrb[8].mxu1 %vm1197_vm2, %v4454_v62 }
 0x129   :  { %1252 = vmatprep.mubr.bf16.mxu1 %v3626_v29  ;;  %1284 = vmatpush1.bf16.msra.mxu1 %v3626_v29 }
 0x12a   :  { %1285 = vmatprep.subr.bf16.mxu1 %v1114_v61 }
 0x12d   :  { %1286 = vmatpush1.bf16.msra.mxu1 %v1113_v59 }
 0x12e   :  { %1429 = vmatprep.subr.bf16.mxu1 %v3626_v29 }
 0x130   :  { %3049 = vmatmul.mubr.msk.bf16.gmra.mrb[12].mxu1 %vm1197_vm2, %v4464_v63 }
 0x131   :  { %1262 = vmatprep.mubr.bf16.mxu1 %v3626_v29 }
 0x138   :  { %3050 = vmatmul.mubr.msk.bf16.gmra.mrb[16].mxu1 %vm1197_vm2, %v4473_v0 }
 0x139   :  { %1272 = vmatprep.mubr.bf16.mxu1 %v3626_v29 }
 0x140   :  { %3051 = vmatmul.mubr.msk.bf16.gmra.mrb[20].mxu1 %vm1197_vm2, %v4481_v1 }
 0x141   :  { %1315 = vmatprep.mubr.bf16.mxu1 %v3626_v29 }
 0x148   :  { %3052 = vmatmul.mubr.msk.bf16.vlgmr.msra.gmra.mrb[24].mxu1 %vm1197_vm2, %v4454_v62 }
 0x149   :  { %1325 = vmatprep.mubr.bf16.mxu1 %v3626_v29  ;;  %1430 = vmatpush1.bf16.msra.mxu1 %v3626_v29 }
 0x150   :  { %3053 = vmatmul.mubr.msk.bf16.gmra.mrb[28].mxu1 %vm1197_vm2, %v4464_v63 }
 0x151   :  { %1335 = vmatprep.mubr.bf16.mxu1 %v3626_v29 }
 0x158   :  { %v930_v2 = vpop.f32.mrb[4].mxu0  ;;  %3054 = vmatmul.mubr.msk.bf16.gmra.mrb[32].mxu1 %vm1197_vm2, %v4473_v0 }
 0x159   :  { %v1007_v3 = vpop.f32.mrb[4].mxu1  ;;  %v932_v5 = vpop.f32.mrb[5].mxu0  ;;  %1345 = vmatprep.mubr.bf16.mxu1 %v3626_v29  ;;  %v931_v7 = vadd.f32 %v930_v2, %v4443_v30 }
 0x15a   :  { %v1009_v6 = vpop.f32.mrb[5].mxu1  ;;  %v1008_v8 = vadd.f32 %v1007_v3, %v4443_v30  ;;  %v933_v9 = vadd.f32 %v932_v5, %v4443_v30 }
 0x15b   :  { %v1010_v11 = vadd.f32 %v1009_v6, %v4443_v30  ;;  %v1097_v17 = vmax.f32 %v931_v7, 0.0 }
 0x15c   :  { %v936_v12 = vpop.f32.mrb[6].mxu0  ;;  %v1099_v18 = vmax.f32 %v1008_v8, 0.0  ;;  %v1098_v21 = vmax.f32 %v933_v9, 0.0 }
 0x15d   :  { %v1013_v51 = vpop.f32.mrb[6].mxu1  ;;  %v937_v47 = vadd.f32 %v936_v12, %v4447_v37  ;;  %v938_v13 = vpop.f32.mrb[7].mxu0  ;;  %v1100_v22 = vmax.f32 %v1010_v11, 0.0 }
 0x15e   :  { %v1014_v50 = vadd.f32 %v1013_v51, %v4447_v37  ;;  %v1015_v14 = vpop.f32.mrb[7].mxu1  ;;  %v939_v15 = vadd.f32 %v938_v13, %v4447_v37 }
 0x15f   :  { %v1016_v16 = vadd.f32 %v1015_v14, %v4447_v37  ;;  %v1105_v19 = vmax.f32 %v937_v47, 0.0 }
 0x160   :  { %v1107_v20 = vmax.f32 %v1014_v50, 0.0  ;;  %v1106_v23 = vmax.f32 %v939_v15, 0.0  ;;  %3055 = vmatmul.mubr.msk.bf16.gmra.mrb[36].mxu1 %vm1197_vm2, %v4481_v1 }
 0x161   :  { %v1108_v24 = vmax.f32 %v1016_v16, 0.0  ;;  %v1115_v25 = vpack.c.bf16 %v1105_v19, %v1097_v17  ;;  %1461 = vmatprep.mubr.bf16.mxu1 %v3626_v29 }
 0x162   :  { %v1117_v26 = vpack.c.bf16 %v1107_v20, %v1099_v18  ;;  %v1116_v27 = vpack.c.bf16 %v1106_v23, %v1098_v21 }
 0x163   :  { %v1118_v28 = vpack.c.bf16 %v1108_v24, %v1100_v22 }
 0x164   :  { %1358 = vmatprep.subr.bf16.mxu0 %v1116_v27 }
 0x165   :  { %1431 = vmatprep.subr.bf16.mxu1 %v1118_v28  ;;  %1359 = vmatpush1.bf16.msra.mxu0 %v1115_v25 }
 0x166   :  { %1432 = vmatpush1.bf16.msra.mxu1 %v1117_v26  ;;  %1502 = vmatprep.subr.bf16.mxu0 %v3626_v29 }
 0x168   :  { %3056 = vmatmul.mubr.msk.bf16.vlgmr.msra.gmra.mrb[12].mxu0 %vm1197_vm2, %v4454_v62 }
 0x169   :  { %3060 = vmatmul.mubr.msk.bf16.vlgmr.msra.gmra.mrb[40].mxu1 %vm1197_vm2, %v4454_v62  ;;  %1398 = vmatprep.mubr.bf16.mxu0 %v3626_v29 }
 0x16a   :  { %1471 = vmatprep.mubr.bf16.mxu1 %v3626_v29  ;;  %1503 = vmatpush1.bf16.msra.mxu0 %v3626_v29 }
 0x170   :  { %3057 = vmatmul.mubr.msk.bf16.gmra.mrb[16].mxu0 %vm1197_vm2, %v4464_v63 }
 0x171   :  { %3061 = vmatmul.mubr.msk.bf16.gmra.mrb[44].mxu1 %vm1197_vm2, %v4464_v63  ;;  %1408 = vmatprep.mubr.bf16.mxu0 %v3626_v29 }
 0x172   :  { %1481 = vmatprep.mubr.bf16.mxu1 %v3626_v29 }
 0x178   :  { %3058 = vmatmul.mubr.msk.bf16.gmra.mrb[20].mxu0 %vm1197_vm2, %v4473_v0 }
 0x179   :  { %3062 = vmatmul.mubr.msk.bf16.gmra.mrb[48].mxu1 %vm1197_vm2, %v4473_v0  ;;  %1418 = vmatprep.mubr.bf16.mxu0 %v3626_v29 }
 0x17a   :  { %1491 = vmatprep.mubr.bf16.mxu1 %v3626_v29 }
 0x180   :  { %3059 = vmatmul.mubr.msk.bf16.gmra.mrb[24].mxu0 %vm1197_vm2, %v4481_v1 }
 0x181   :  { %3063 = vmatmul.mubr.msk.bf16.gmra.mrb[52].mxu1 %vm1197_vm2, %v4481_v1  ;;  %1534 = vmatprep.mubr.bf16.mxu0 %v3626_v29 }
 0x182   :  { %1860 = vmatprep.mubr.bf16.mxu1 %v3626_v29 }
 0x198   :  { %v1084_v4 = vpop.f32.mrb[8].mxu0 }
 0x199   :  { %v1086_v31 = vpop.f32.mrb[9].mxu0  ;;  %v1085_v32 = vadd.f32 %v1084_v4, %v4443_v30 }
 0x19a   :  { %v1087_v33 = vadd.f32 %v1086_v31, %v4443_v30  ;;  %v4549_v30 = vpop.permute.xlu0 %1139 }
 0x19b   :  { %v1101_v38 = vmax.f32 %v1085_v32, 0.0 }
 0x19c   :  { %v1090_v34 = vpop.f32.mrb[10].mxu0  ;;  %v1102_v10 = vmax.f32 %v1087_v33, 0.0 }
 0x19d   :  { %v1091_v55 = vadd.f32 %v1090_v34, %v4447_v37  ;;  %v1092_v35 = vpop.f32.mrb[11].mxu0 }
 0x19e   :  { %v1093_v36 = vadd.f32 %v1092_v35, %v4447_v37  ;;  %v4559_v60 = vpop.permute.xlu0 %1149 }
 0x19f   :  { %v1109_v39 = vmax.f32 %v1091_v55, 0.0 }
 0x1a0   :  { %v1110_v40 = vmax.f32 %v1093_v36, 0.0 }
 0x1a1   :  { %v1119_v41 = vpack.c.bf16 %v1109_v39, %v1101_v38 }
 0x1a2   :  { %v1120_v42 = vpack.c.bf16 %v1110_v40, %v1102_v10  ;;  %v4573_v47 = vpop.permute.xlu0 %1159 }
 0x1a4   :  { %1504 = vmatprep.subr.bf16.mxu0 %v1120_v42 }
 0x1a5   :  { %1505 = vmatpush1.bf16.msra.mxu0 %v1119_v41 }
 0x1a6   :  { %v4585_v27 = vpop.permute.xlu0 %1169 }
 0x1a8   :  { %3064 = vmatmul.mubr.msk.bf16.vlgmr.msra.gmra.mrb[28].mxu0 %vm1197_vm2, %v4454_v62 }
 0x1a9   :  { %1544 = vmatprep.mubr.bf16.mxu0 %v3626_v29 }
 0x1b0   :  { %3065 = vmatmul.mubr.msk.bf16.gmra.mrb[32].mxu0 %vm1197_vm2, %v4464_v63 }
 0x1b1   :  { %1554 = vmatprep.mubr.bf16.mxu0 %v3626_v29 }
 0x1b8   :  { %3066 = vmatmul.mubr.msk.bf16.gmra.mrb[36].mxu0 %vm1197_vm2, %v4473_v0 }
 0x1b9   :  { %1564 = vmatprep.mubr.bf16.mxu0 %v3626_v29 }
 0x1c0   :  { %3067 = vmatmul.mubr.msk.bf16.gmra.mrb[40].mxu0 %vm1197_vm2, %v4481_v1  ;;  %v4564_v1 = vpop.permute.xlu1 %1154 }
 0x1c1   :  { %1945 = vmatprep.mubr.bf16.mxu0 %v3626_v29 }
 0x1c4   :  { %v4578_v16 = vpop.permute.xlu1 %1164 }
 0x1c8   :  { %v4588_v33 = vpop.permute.xlu1 %1174 }
 0x1fb   :  { %v1244_v37 = vpop.f32.mrb[8].mxu1 }
 0x1fc   :  { %v1245_v43 = vadd.f32 %v1244_v37, %v4549_v30  ;;  %v1246_v44 = vpop.f32.mrb[9].mxu1 }
 0x1fd   :  { %v1247_v46 = vadd.f32 %v1246_v44, %v4549_v30  ;;  %v1248_v48 = vpop.f32.mrb[10].mxu1 }
 0x1fe   :  { %v1249_v49 = vadd.f32 %v1248_v48, %v4552_v45  ;;  %v1250_v52 = vpop.f32.mrb[11].mxu1  ;;  %v1575_v54 = vmax.f32 %v1245_v43, 0.0 }
 0x1ff   :  { %v1251_v53 = vadd.f32 %v1250_v52, %v4552_v45  ;;  %v1576_v57 = vmax.f32 %v1247_v46, 0.0  ;;  %v4598_v52 = vld [vmem:[%s5023_s2 + $0x30] sm:$0xff]  }
 0x200   :  { %v1585_v56 = vmax.f32 %v1249_v49, 0.0 }
 0x201   :  { %v1586_v58 = vmax.f32 %v1251_v53, 0.0 }
 0x202   :  { %v4557_v59 = vpack.c.bf16 %v1585_v56, %v1575_v54 }
 0x203   :  { %v4561_v61 = vpack.c.bf16 %v1586_v58, %v1576_v57  ;;  %v1254_v62 = vpop.f32.mrb[12].mxu1 }
 0x204   :  { %v1255_v63 = vadd.f32 %v1254_v62, %v4559_v60  ;;  %v1256_v0 = vpop.f32.mrb[13].mxu1 }
 0x205   :  { %v1257_v2 = vadd.f32 %v1256_v0, %v4559_v60  ;;  %v1258_v3 = vpop.f32.mrb[14].mxu1  ;;  %1828 = vmatprep.subr.bf16.mxu1 %v4561_v61 }
 0x206   :  { %v1259_v5 = vadd.f32 %v1258_v3, %v4564_v1  ;;  %v1260_v6 = vpop.f32.mrb[15].mxu1  ;;  %1829 = vmatpush1.bf16.msra.mxu1 %v4557_v59  ;;  %v1595_v8 = vmax.f32 %v1255_v63, 0.0 }
 0x207   :  { %v1261_v7 = vadd.f32 %v1260_v6, %v4564_v1  ;;  %v1596_v11 = vmax.f32 %v1257_v2, 0.0 }
 0x208   :  { %v1605_v9 = vmax.f32 %v1259_v5, 0.0 }
 0x209   :  { %v1606_v12 = vmax.f32 %v1261_v7, 0.0 }
 0x20a   :  { %v4571_v51 = vpack.c.bf16 %v1605_v9, %v1595_v8  ;;  %v4610_v9 = vld [vmem:[%s5023_s2 + $0x38] sm:$0xff]  }
 0x20b   :  { %v4575_v50 = vpack.c.bf16 %v1606_v12, %v1596_v11  ;;  %v1264_v13 = vpop.f32.mrb[16].mxu1 }
 0x20c   :  { %v1265_v14 = vadd.f32 %v1264_v13, %v4573_v47  ;;  %v1266_v15 = vpop.f32.mrb[17].mxu1 }
 0x20d   :  { %v1267_v17 = vadd.f32 %v1266_v15, %v4573_v47  ;;  %v1268_v18 = vpop.f32.mrb[18].mxu1  ;;  %1830 = vmatprep.subr.bf16.mxu1 %v4575_v50 }
 0x20e   :  { %v1269_v19 = vadd.f32 %v1268_v18, %v4578_v16  ;;  %v1270_v20 = vpop.f32.mrb[19].mxu1  ;;  %1831 = vmatpush1.bf16.msra.mxu1 %v4571_v51  ;;  %v1615_v22 = vmax.f32 %v1265_v14, 0.0 }
 0x20f   :  { %v1271_v21 = vadd.f32 %v1270_v20, %v4578_v16  ;;  %v1616_v24 = vmax.f32 %v1267_v17, 0.0 }
 0x210   :  { %v1625_v23 = vmax.f32 %v1269_v19, 0.0 }
 0x211   :  { %v1626_v25 = vmax.f32 %v1271_v21, 0.0 }
 0x212   :  { %v1675_v26 = vpack.c.bf16 %v1625_v23, %v1615_v22 }
 0x213   :  { %v1676_v28 = vpack.c.bf16 %v1626_v25, %v1616_v24  ;;  %v1274_v4 = vpop.f32.mrb[20].mxu1 }
 0x214   :  { %v1275_v31 = vadd.f32 %v1274_v4, %v4585_v27  ;;  %v1276_v32 = vpop.f32.mrb[21].mxu1 }
 0x215   :  { %v1277_v34 = vadd.f32 %v1276_v32, %v4585_v27  ;;  %v1278_v55 = vpop.f32.mrb[22].mxu1  ;;  %1832 = vmatprep.subr.bf16.mxu1 %v1676_v28 }
 0x216   :  { %v1279_v35 = vadd.f32 %v1278_v55, %v4588_v33  ;;  %v1280_v36 = vpop.f32.mrb[23].mxu1  ;;  %1833 = vmatpush1.bf16.msra.mxu1 %v1675_v26  ;;  %v1635_v39 = vmax.f32 %v1275_v31, 0.0  ;;  %v4622_v26 = vld [vmem:[%s5023_s2 + $0x40] sm:$0xff]  }
 0x217   :  { %v1281_v38 = vadd.f32 %v1280_v36, %v4588_v33  ;;  %v1636_v40 = vmax.f32 %v1277_v34, 0.0 }
 0x218   :  { %v1645_v10 = vmax.f32 %v1279_v35, 0.0 }
 0x219   :  { %v1646_v41 = vmax.f32 %v1281_v38, 0.0 }
 0x21a   :  { %v1685_v42 = vpack.c.bf16 %v1645_v10, %v1635_v39 }
 0x21b   :  { %v1686_v37 = vpack.c.bf16 %v1646_v41, %v1636_v40  ;;  %v1317_v43 = vpop.f32.mrb[24].mxu1 }
 0x21c   :  { %v1318_v44 = vadd.f32 %v1317_v43, %v4549_v30  ;;  %v1319_v46 = vpop.f32.mrb[25].mxu1 }
 0x21d   :  { %v1320_v48 = vadd.f32 %v1319_v46, %v4549_v30  ;;  %v1321_v49 = vpop.f32.mrb[26].mxu1  ;;  %1834 = vmatprep.subr.bf16.mxu1 %v1686_v37  ;;  %v4634_v37 = vld [vmem:[%s5023_s2 + $0x48] sm:$0xff]  }
 0x21e   :  { %v1322_v53 = vadd.f32 %v1321_v49, %v4552_v45  ;;  %v1323_v54 = vpop.f32.mrb[27].mxu1  ;;  %1835 = vmatpush1.bf16.msra.mxu1 %v1685_v42  ;;  %v1577_v57 = vmax.f32 %v1318_v44, 0.0 }
 0x21f   :  { %v1324_v56 = vadd.f32 %v1323_v54, %v4552_v45  ;;  %v1578_v62 = vmax.f32 %v1320_v48, 0.0 }
 0x220   :  { %v1587_v58 = vmax.f32 %v1322_v53, 0.0 }
 0x221   :  { %v1588_v63 = vmax.f32 %v1324_v56, 0.0  ;;  %3074 = vmatmul.mubr.msk.bf16.vlgmr.msra.gmra.mrb[56].mxu1 %vm1809_vm3, %v4598_v52 }
 0x222   :  { %v1657_v0 = vpack.c.bf16 %v1587_v58, %v1577_v57  ;;  %1870 = vmatprep.mubr.bf16.mxu1 %v3626_v29 }
 0x223   :  { %v1658_v2 = vpack.c.bf16 %v1588_v63, %v1578_v62  ;;  %v1327_v3 = vpop.f32.mrb[28].mxu1 }
 0x224   :  { %v1328_v5 = vadd.f32 %v1327_v3, %v4559_v60  ;;  %v1329_v6 = vpop.f32.mrb[29].mxu1 }
 0x225   :  { %v1330_v7 = vadd.f32 %v1329_v6, %v4559_v60  ;;  %v1331_v8 = vpop.f32.mrb[30].mxu1  ;;  %1913 = vmatprep.subr.bf16.mxu0 %v1658_v2 }
 0x226   :  { %v1332_v11 = vadd.f32 %v1331_v8, %v4564_v1  ;;  %v1333_v12 = vpop.f32.mrb[31].mxu1  ;;  %1914 = vmatpush1.bf16.msra.mxu0 %v1657_v0  ;;  %v1597_v14 = vmax.f32 %v1328_v5, 0.0 }
 0x227   :  { %v1334_v13 = vadd.f32 %v1333_v12, %v4564_v1  ;;  %v1598_v17 = vmax.f32 %v1330_v7, 0.0 }
 0x228   :  { %v1607_v15 = vmax.f32 %v1332_v11, 0.0  ;;  %v4648_v11 = vld [vmem:[%s5023_s2 + $0x50] sm:$0xff]  }
 0x229   :  { %v1608_v18 = vmax.f32 %v1334_v13, 0.0  ;;  %3075 = vmatmul.mubr.msk.bf16.gmra.mrb[60].mxu1 %vm1809_vm3, %v4610_v9 }
 0x22a   :  { %v1667_v19 = vpack.c.bf16 %v1607_v15, %v1597_v14  ;;  %1880 = vmatprep.mubr.bf16.mxu1 %v3626_v29 }
 0x22b   :  { %v1668_v20 = vpack.c.bf16 %v1608_v18, %v1598_v17  ;;  %v1337_v21 = vpop.f32.mrb[32].mxu1 }
 0x22c   :  { %v1338_v22 = vadd.f32 %v1337_v21, %v4573_v47  ;;  %v1339_v23 = vpop.f32.mrb[33].mxu1 }
 0x22d   :  { %v1340_v24 = vadd.f32 %v1339_v23, %v4573_v47  ;;  %v1341_v25 = vpop.f32.mrb[34].mxu1  ;;  %1915 = vmatprep.subr.bf16.mxu0 %v1668_v20 }
 0x22e   :  { %v1342_v28 = vadd.f32 %v1341_v25, %v4578_v16  ;;  %v1343_v4 = vpop.f32.mrb[35].mxu1  ;;  %1916 = vmatpush1.bf16.msra.mxu0 %v1667_v19  ;;  %v1617_v32 = vmax.f32 %v1338_v22, 0.0 }
 0x22f   :  { %v1344_v31 = vadd.f32 %v1343_v4, %v4578_v16  ;;  %v1618_v55 = vmax.f32 %v1340_v24, 0.0 }
 0x230   :  { %v1627_v34 = vmax.f32 %v1342_v28, 0.0 }
 0x231   :  { %v1628_v35 = vmax.f32 %v1344_v31, 0.0  ;;  %3076 = vmatmul.mubr.msk.bf16.gmra.mrb[64].mxu1 %vm1809_vm3, %v4622_v26 }
 0x232   :  { %v1677_v36 = vpack.c.bf16 %v1627_v34, %v1617_v32  ;;  %1890 = vmatprep.mubr.bf16.mxu1 %v3626_v29 }
 0x233   :  { %v1678_v38 = vpack.c.bf16 %v1628_v35, %v1618_v55  ;;  %v1347_v39 = vpop.f32.mrb[36].mxu1 }
 0x234   :  { %v1348_v10 = vadd.f32 %v1347_v39, %v4585_v27  ;;  %v1349_v40 = vpop.f32.mrb[37].mxu1 }
 0x235   :  { %v1350_v41 = vadd.f32 %v1349_v40, %v4585_v27  ;;  %v1351_v42 = vpop.f32.mrb[38].mxu1  ;;  %1917 = vmatprep.subr.bf16.mxu0 %v1678_v38 }
 0x236   :  { %v1352_v43 = vadd.f32 %v1351_v42, %v4588_v33  ;;  %v1353_v44 = vpop.f32.mrb[39].mxu1  ;;  %1918 = vmatpush1.bf16.msra.mxu0 %v1677_v36  ;;  %v1637_v48 = vmax.f32 %v1348_v10, 0.0 }
 0x237   :  { %v1354_v46 = vadd.f32 %v1353_v44, %v4588_v33  ;;  %v1638_v53 = vmax.f32 %v1350_v41, 0.0  ;;  %v4667_v44 = vld [vmem:[%s5023_s2 + $0x58] sm:$0xff]  }
 0x238   :  { %v1647_v49 = vmax.f32 %v1352_v43, 0.0 }
 0x239   :  { %v1648_v54 = vmax.f32 %v1354_v46, 0.0  ;;  %3077 = vmatmul.mubr.msk.bf16.gmra.mrb[68].mxu1 %vm1809_vm3, %v4634_v37 }
 0x23a   :  { %v1687_v56 = vpack.c.bf16 %v1647_v49, %v1637_v48  ;;  %1900 = vmatprep.mubr.bf16.mxu1 %v3626_v29 }
 0x23b   :  { %v1688_v57 = vpack.c.bf16 %v1648_v54, %v1638_v53  ;;  %v1390_v58 = vpop.f32.mrb[12].mxu0 }
 0x23c   :  { %v1463_v62 = vpop.f32.mrb[40].mxu1  ;;  %v1391_v63 = vadd.f32 %v1390_v58, %v4549_v30  ;;  %v1392_v2 = vpop.f32.mrb[13].mxu0 }
 0x23d   :  { %v1464_v0 = vadd.f32 %v1463_v62, %v4549_v30  ;;  %v1465_v3 = vpop.f32.mrb[41].mxu1  ;;  %v1393_v5 = vadd.f32 %v1392_v2, %v4549_v30  ;;  %v1394_v7 = vpop.f32.mrb[14].mxu0  ;;  %1919 = vmatprep.subr.bf16.mxu0 %v1688_v57 }
 0x23e   :  { %v1466_v6 = vadd.f32 %v1465_v3, %v4549_v30  ;;  %v1467_v8 = vpop.f32.mrb[42].mxu1  ;;  %v1395_v12 = vadd.f32 %v1394_v7, %v4552_v45  ;;  %v1396_v14 = vpop.f32.mrb[15].mxu0  ;;  %1920 = vmatpush1.bf16.msra.mxu0 %v1687_v56  ;;  %v1579_v19 = vmax.f32 %v1391_v63, 0.0 }
 0x23f   :  { %v1468_v13 = vadd.f32 %v1467_v8, %v4552_v45  ;;  %v1469_v15 = vpop.f32.mrb[43].mxu1  ;;  %v1397_v17 = vadd.f32 %v1396_v14, %v4552_v45  ;;  %v1581_v20 = vmax.f32 %v1464_v0, 0.0  ;;  %v1580_v23 = vmax.f32 %v1393_v5, 0.0 }
 0x240   :  { %v1470_v18 = vadd.f32 %v1469_v15, %v4552_v45  ;;  %v1589_v21 = vmax.f32 %v1395_v12, 0.0  ;;  %v1582_v24 = vmax.f32 %v1466_v6, 0.0 }
 0x241   :  { %v1591_v22 = vmax.f32 %v1468_v13, 0.0  ;;  %v1590_v25 = vmax.f32 %v1397_v17, 0.0  ;;  %3080 = vmatmul.mubr.msk.bf16.vlgmr.msra.gmra.mrb[44].mxu0 %vm1809_vm3, %v4598_v52  ;;  %3078 = vmatmul.mubr.msk.bf16.gmra.mrb[72].mxu1 %vm1809_vm3, %v4648_v11 }
 0x242   :  { %v1592_v28 = vmax.f32 %v1470_v18, 0.0  ;;  %v1659_v4 = vpack.c.bf16 %v1589_v21, %v1579_v19  ;;  %1951 = vmatprep.mubr.bf16.mxu0 %v3626_v29  ;;  %1906 = vmatprep.mubr.bf16.mxu1 %v3626_v29 }
 0x243   :  { %v1661_v31 = vpack.c.bf16 %v1591_v22, %v1581_v20  ;;  %v1660_v32 = vpack.c.bf16 %v1590_v25, %v1580_v23  ;;  %v1400_v55 = vpop.f32.mrb[16].mxu0 }
 0x244   :  { %v1662_v34 = vpack.c.bf16 %v1592_v28, %v1582_v24  ;;  %v1473_v35 = vpop.f32.mrb[44].mxu1  ;;  %v1401_v36 = vadd.f32 %v1400_v55, %v4559_v60  ;;  %v1402_v39 = vpop.f32.mrb[17].mxu0 }
 0x245   :  { %v1474_v38 = vadd.f32 %v1473_v35, %v4559_v60  ;;  %v1475_v10 = vpop.f32.mrb[45].mxu1  ;;  %v1403_v40 = vadd.f32 %v1402_v39, %v4559_v60  ;;  %v1404_v42 = vpop.f32.mrb[18].mxu0  ;;  %1990 = vmatprep.subr.bf16.mxu1 %v1660_v32 }
 0x246   :  { %v1476_v41 = vadd.f32 %v1475_v10, %v4559_v60  ;;  %v1477_v43 = vpop.f32.mrb[46].mxu1  ;;  %2067 = vmatprep.subr.bf16.mxu0 %v1662_v34  ;;  %v1405_v46 = vadd.f32 %v1404_v42, %v4564_v1  ;;  %v1406_v49 = vpop.f32.mrb[19].mxu0  ;;  %1991 = vmatpush1.bf16.msra.mxu1 %v1659_v4  ;;  %v1599_v57 = vmax.f32 %v1401_v36, 0.0 }
 0x247   :  { %v1478_v48 = vadd.f32 %v1477_v43, %v4564_v1  ;;  %v1479_v53 = vpop.f32.mrb[47].mxu1  ;;  %2068 = vmatpush1.bf16.msra.mxu0 %v1661_v31  ;;  %v1407_v54 = vadd.f32 %v1406_v49, %v4564_v1  ;;  %v1601_v58 = vmax.f32 %v1474_v38, 0.0  ;;  %v1600_v0 = vmax.f32 %v1403_v40, 0.0 }
 0x248   :  { %v1480_v56 = vadd.f32 %v1479_v53, %v4564_v1  ;;  %v1609_v62 = vmax.f32 %v1405_v46, 0.0  ;;  %v1602_v2 = vmax.f32 %v1476_v41, 0.0 }
 0x249   :  { %v1611_v63 = vmax.f32 %v1478_v48, 0.0  ;;  %v1610_v3 = vmax.f32 %v1407_v54, 0.0  ;;  %3081 = vmatmul.mubr.msk.bf16.gmra.mrb[48].mxu0 %vm1809_vm3, %v4610_v9  ;;  %3079 = vmatmul.mubr.msk.bf16.gmra.mrb[76].mxu1 %vm1809_vm3, %v4667_v44 }
 0x24a   :  { %v1612_v5 = vmax.f32 %v1480_v56, 0.0  ;;  %v1669_v6 = vpack.c.bf16 %v1609_v62, %v1599_v57  ;;  %1957 = vmatprep.mubr.bf16.mxu0 %v3626_v29  ;;  %2022 = vmatprep.mubr.bf16.mxu1 %v3626_v29 }
 0x24b   :  { %v1671_v7 = vpack.c.bf16 %v1611_v63, %v1601_v58  ;;  %v1670_v8 = vpack.c.bf16 %v1610_v3, %v1600_v0  ;;  %v1410_v13 = vpop.f32.mrb[20].mxu0 }
 0x24c   :  { %v1672_v12 = vpack.c.bf16 %v1612_v5, %v1602_v2  ;;  %v1483_v14 = vpop.f32.mrb[48].mxu1  ;;  %v1411_v15 = vadd.f32 %v1410_v13, %v4573_v47  ;;  %v1412_v18 = vpop.f32.mrb[21].mxu0 }
 0x24d   :  { %v1484_v17 = vadd.f32 %v1483_v14, %v4573_v47  ;;  %v1485_v19 = vpop.f32.mrb[49].mxu1  ;;  %v1413_v20 = vadd.f32 %v1412_v18, %v4573_v47  ;;  %v1414_v22 = vpop.f32.mrb[22].mxu0  ;;  %1992 = vmatprep.subr.bf16.mxu1 %v1670_v8 }
 0x24e   :  { %v1486_v21 = vadd.f32 %v1485_v19, %v4573_v47  ;;  %v1487_v23 = vpop.f32.mrb[50].mxu1  ;;  %2069 = vmatprep.subr.bf16.mxu0 %v1672_v12  ;;  %v1415_v24 = vadd.f32 %v1414_v22, %v4578_v16  ;;  %v1416_v28 = vpop.f32.mrb[23].mxu0  ;;  %1993 = vmatpush1.bf16.msra.mxu1 %v1669_v6  ;;  %v1619_v34 = vmax.f32 %v1411_v15, 0.0 }
 0x24f   :  { %v1488_v25 = vadd.f32 %v1487_v23, %v4578_v16  ;;  %v1489_v4 = vpop.f32.mrb[51].mxu1  ;;  %2070 = vmatpush1.bf16.msra.mxu0 %v1671_v7  ;;  %v1417_v31 = vadd.f32 %v1416_v28, %v4578_v16  ;;  %v1621_v55 = vmax.f32 %v1484_v17, 0.0  ;;  %v1620_v38 = vmax.f32 %v1413_v20, 0.0 }
 0x250   :  { %v1490_v32 = vadd.f32 %v1489_v4, %v4578_v16  ;;  %v1629_v35 = vmax.f32 %v1415_v24, 0.0  ;;  %v1622_v39 = vmax.f32 %v1486_v21, 0.0 }
 0x251   :  { %v1631_v36 = vmax.f32 %v1488_v25, 0.0  ;;  %v1630_v10 = vmax.f32 %v1417_v31, 0.0  ;;  %3082 = vmatmul.mubr.msk.bf16.gmra.mrb[52].mxu0 %vm1809_vm3, %v4622_v26 }
 0x252   :  { %v1632_v40 = vmax.f32 %v1490_v32, 0.0  ;;  %v1679_v41 = vpack.c.bf16 %v1629_v35, %v1619_v34  ;;  %1963 = vmatprep.mubr.bf16.mxu0 %v3626_v29 }
 0x253   :  { %v1681_v42 = vpack.c.bf16 %v1631_v36, %v1621_v55  ;;  %v1680_v43 = vpack.c.bf16 %v1630_v10, %v1620_v38  ;;  %v1420_v48 = vpop.f32.mrb[24].mxu0 }
 0x254   :  { %v1682_v46 = vpack.c.bf16 %v1632_v40, %v1622_v39  ;;  %v1493_v49 = vpop.f32.mrb[52].mxu1  ;;  %v1421_v53 = vadd.f32 %v1420_v48, %v4585_v27  ;;  %v1422_v56 = vpop.f32.mrb[25].mxu0 }
 0x255   :  { %v1494_v54 = vadd.f32 %v1493_v49, %v4585_v27  ;;  %v1495_v57 = vpop.f32.mrb[53].mxu1  ;;  %v1423_v58 = vadd.f32 %v1422_v56, %v4585_v27  ;;  %v1424_v63 = vpop.f32.mrb[26].mxu0  ;;  %1994 = vmatprep.subr.bf16.mxu1 %v1680_v43 }
 0x256   :  { %v1496_v62 = vadd.f32 %v1495_v57, %v4585_v27  ;;  %v1497_v0 = vpop.f32.mrb[54].mxu1  ;;  %2071 = vmatprep.subr.bf16.mxu0 %v1682_v46  ;;  %v1425_v2 = vadd.f32 %v1424_v63, %v4588_v33  ;;  %v1426_v5 = vpop.f32.mrb[27].mxu0  ;;  %1995 = vmatpush1.bf16.msra.mxu1 %v1679_v41  ;;  %v1639_v12 = vmax.f32 %v1421_v53, 0.0 }
 0x257   :  { %v1498_v3 = vadd.f32 %v1497_v0, %v4588_v33  ;;  %v1499_v6 = vpop.f32.mrb[55].mxu1  ;;  %2072 = vmatpush1.bf16.msra.mxu0 %v1681_v42  ;;  %v1427_v7 = vadd.f32 %v1426_v5, %v4588_v33  ;;  %v1641_v13 = vmax.f32 %v1494_v54, 0.0  ;;  %v1640_v17 = vmax.f32 %v1423_v58, 0.0 }
 0x258   :  { %v1500_v8 = vadd.f32 %v1499_v6, %v4588_v33  ;;  %v1649_v14 = vmax.f32 %v1425_v2, 0.0  ;;  %v1642_v18 = vmax.f32 %v1496_v62, 0.0 }
 0x259   :  { %v1651_v15 = vmax.f32 %v1498_v3, 0.0  ;;  %v1650_v19 = vmax.f32 %v1427_v7, 0.0  ;;  %3083 = vmatmul.mubr.msk.bf16.gmra.mrb[56].mxu0 %vm1809_vm3, %v4634_v37 }
 0x25a   :  { %v1652_v20 = vmax.f32 %v1500_v8, 0.0  ;;  %v1689_v21 = vpack.c.bf16 %v1649_v14, %v1639_v12  ;;  %1969 = vmatprep.mubr.bf16.mxu0 %v3626_v29 }
 0x25b   :  { %v1691_v22 = vpack.c.bf16 %v1651_v15, %v1641_v13  ;;  %v1690_v23 = vpack.c.bf16 %v1650_v19, %v1640_v17 }
 0x25c   :  { %v1692_v24 = vpack.c.bf16 %v1652_v20, %v1642_v18 }
 0x25d   :  { %1996 = vmatprep.subr.bf16.mxu1 %v1690_v23 }
 0x25e   :  { %2073 = vmatprep.subr.bf16.mxu0 %v1692_v24  ;;  %1997 = vmatpush1.bf16.msra.mxu1 %v1689_v21 }
 0x25f   :  { %2074 = vmatpush1.bf16.msra.mxu0 %v1691_v22 }
 0x260   :  { %2354 = vmatprep.subr.bf16.mxu0 %v4561_v61 }
 0x261   :  { %3084 = vmatmul.mubr.msk.bf16.gmra.mrb[60].mxu0 %vm1809_vm3, %v4648_v11  ;;  %3086 = vmatmul.mubr.msk.bf16.vlgmr.msra.gmra.mrb[80].mxu1 %vm1809_vm3, %v4598_v52 }
 0x262   :  { %1979 = vmatprep.mubr.bf16.mxu0 %v3626_v29  ;;  %2028 = vmatprep.mubr.bf16.mxu1 %v3626_v29 }
 0x269   :  { %3085 = vmatmul.mubr.msk.bf16.gmra.mrb[64].mxu0 %vm1809_vm3, %v4667_v44  ;;  %3087 = vmatmul.mubr.msk.bf16.gmra.mrb[84].mxu1 %vm1809_vm3, %v4610_v9 }
 0x26a   :  { %2034 = vmatprep.mubr.bf16.mxu1 %v3626_v29  ;;  %2099 = vmatprep.mubr.bf16.mxu0 %v3626_v29 }
 0x271   :  { %3088 = vmatmul.mubr.msk.bf16.gmra.mrb[88].mxu1 %vm1809_vm3, %v4622_v26  ;;  %3092 = vmatmul.mubr.msk.bf16.vlgmr.msra.gmra.mrb[68].mxu0 %vm1809_vm3, %v4598_v52 }
 0x272   :  { %2355 = vmatpush1.bf16.msra.mxu0 %v4557_v59  ;;  %2040 = vmatprep.mubr.bf16.mxu1 %v3626_v29 }
 0x273   :  { %2356 = vmatprep.subr.bf16.mxu0 %v4575_v50  ;;  %2105 = vmatprep.mubr.bf16.mxu0 %v3626_v29 }
 0x276   :  { %2357 = vmatpush1.bf16.msra.mxu0 %v4571_v51 }
 0x279   :  { %3089 = vmatmul.mubr.msk.bf16.gmra.mrb[92].mxu1 %vm1809_vm3, %v4634_v37  ;;  %3093 = vmatmul.mubr.msk.bf16.gmra.mrb[72].mxu0 %vm1809_vm3, %v4610_v9 }
 0x27a   :  { %2046 = vmatprep.mubr.bf16.mxu1 %v3626_v29  ;;  %2111 = vmatprep.mubr.bf16.mxu0 %v3626_v29 }
 0x27b   :  { %v1536_v61 = vpop.f32.mrb[28].mxu0 }
 0x27c   :  { %v1537_v59 = vadd.f32 %v1536_v61, %v4549_v30  ;;  %v1538_v25 = vpop.f32.mrb[29].mxu0 }
 0x27d   :  { %v1539_v50 = vadd.f32 %v1538_v25, %v4549_v30  ;;  %v1540_v28 = vpop.f32.mrb[30].mxu0 }
 0x27e   :  { %v1541_v4 = vadd.f32 %v1540_v28, %v4552_v45  ;;  %v1542_v51 = vpop.f32.mrb[31].mxu0  ;;  %v1583_v32 = vmax.f32 %v1537_v59, 0.0 }
 0x27f   :  { %v1543_v31 = vadd.f32 %v1542_v51, %v4552_v45  ;;  %v1584_v55 = vmax.f32 %v1539_v50, 0.0 }
 0x280   :  { %v1593_v34 = vmax.f32 %v1541_v4, 0.0 }
 0x281   :  { %v1594_v35 = vmax.f32 %v1543_v31, 0.0  ;;  %3090 = vmatmul.mubr.msk.bf16.gmra.mrb[96].mxu1 %vm1809_vm3, %v4648_v11  ;;  %3094 = vmatmul.mubr.msk.bf16.gmra.mrb[76].mxu0 %vm1809_vm3, %v4622_v26 }
 0x282   :  { %v1663_v36 = vpack.c.bf16 %v1593_v34, %v1583_v32  ;;  %2056 = vmatprep.mubr.bf16.mxu1 %v3626_v29  ;;  %2117 = vmatprep.mubr.bf16.mxu0 %v3626_v29 }
 0x283   :  { %v1664_v30 = vpack.c.bf16 %v1594_v35, %v1584_v55  ;;  %v1546_v38 = vpop.f32.mrb[32].mxu0 }
 0x284   :  { %v1547_v39 = vadd.f32 %v1546_v38, %v4559_v60  ;;  %v1548_v45 = vpop.f32.mrb[33].mxu0 }
 0x285   :  { %v1549_v10 = vadd.f32 %v1548_v45, %v4559_v60  ;;  %v1550_v40 = vpop.f32.mrb[34].mxu0  ;;  %2144 = vmatprep.subr.bf16.mxu1 %v1664_v30 }
 0x286   :  { %v1551_v41 = vadd.f32 %v1550_v40, %v4564_v1  ;;  %v1552_v42 = vpop.f32.mrb[35].mxu0  ;;  %2145 = vmatpush1.bf16.msra.mxu1 %v1663_v36  ;;  %v1603_v46 = vmax.f32 %v1547_v39, 0.0 }
 0x287   :  { %v1553_v43 = vadd.f32 %v1552_v42, %v4564_v1  ;;  %v1604_v49 = vmax.f32 %v1549_v10, 0.0 }
 0x288   :  { %v1613_v48 = vmax.f32 %v1551_v41, 0.0 }
 0x289   :  { %v1614_v53 = vmax.f32 %v1553_v43, 0.0  ;;  %3091 = vmatmul.mubr.msk.bf16.gmra.mrb[100].mxu1 %vm1809_vm3, %v4667_v44  ;;  %3095 = vmatmul.mubr.msk.bf16.gmra.mrb[80].mxu0 %vm1809_vm3, %v4634_v37 }
 0x28a   :  { %v1673_v54 = vpack.c.bf16 %v1613_v48, %v1603_v46  ;;  %2123 = vmatprep.mubr.bf16.mxu0 %v3626_v29  ;;  %2176 = vmatprep.mubr.bf16.mxu1 %v3626_v29 }
 0x28b   :  { %v1674_v60 = vpack.c.bf16 %v1614_v53, %v1604_v49  ;;  %v1556_v56 = vpop.f32.mrb[36].mxu0 }
 0x28c   :  { %v1557_v57 = vadd.f32 %v1556_v56, %v4573_v47  ;;  %v1558_v1 = vpop.f32.mrb[37].mxu0 }
 0x28d   :  { %v1559_v58 = vadd.f32 %v1558_v1, %v4573_v47  ;;  %v1560_v62 = vpop.f32.mrb[38].mxu0  ;;  %2146 = vmatprep.subr.bf16.mxu1 %v1674_v60 }
 0x28e   :  { %v1561_v63 = vadd.f32 %v1560_v62, %v4578_v16  ;;  %v1562_v0 = vpop.f32.mrb[39].mxu0  ;;  %2147 = vmatpush1.bf16.msra.mxu1 %v1673_v54  ;;  %v1623_v3 = vmax.f32 %v1557_v57, 0.0 }
 0x28f   :  { %v1563_v2 = vadd.f32 %v1562_v0, %v4578_v16  ;;  %v1624_v6 = vmax.f32 %v1559_v58, 0.0  ;;  %v4814_v0 = vpop.permute.xlu1 %1766 }
 0x290   :  { %v1633_v5 = vmax.f32 %v1561_v63, 0.0  ;;  %v4812_v63 = vpop.permute.xlu0 %1761 }
 0x291   :  { %v1634_v7 = vmax.f32 %v1563_v2, 0.0  ;;  %3096 = vmatmul.mubr.msk.bf16.gmra.mrb[84].mxu0 %vm1809_vm3, %v4648_v11 }
 0x292   :  { %v1683_v8 = vpack.c.bf16 %v1633_v5, %v1623_v3  ;;  %2133 = vmatprep.mubr.bf16.mxu0 %v3626_v29 }
 0x293   :  { %v1684_v12 = vpack.c.bf16 %v1634_v7, %v1624_v6  ;;  %v1566_v47 = vpop.f32.mrb[40].mxu0 }
 0x294   :  { %v1567_v13 = vadd.f32 %v1566_v47, %v4585_v27  ;;  %v1568_v14 = vpop.f32.mrb[41].mxu0 }
 0x295   :  { %v1569_v15 = vadd.f32 %v1568_v14, %v4585_v27  ;;  %v1570_v17 = vpop.f32.mrb[42].mxu0  ;;  %2148 = vmatprep.subr.bf16.mxu1 %v1684_v12 }
 0x296   :  { %v1571_v16 = vadd.f32 %v1570_v17, %v4588_v33  ;;  %v1572_v18 = vpop.f32.mrb[43].mxu0  ;;  %2149 = vmatpush1.bf16.msra.mxu1 %v1683_v8  ;;  %v1643_v20 = vmax.f32 %v1567_v13, 0.0 }
 0x297   :  { %v1573_v19 = vadd.f32 %v1572_v18, %v4588_v33  ;;  %v1644_v22 = vmax.f32 %v1569_v15, 0.0  ;;  %v4819_v18 = vpop.permute.xlu0 %1771 }
 0x298   :  { %v1653_v21 = vmax.f32 %v1571_v16, 0.0 }
 0x299   :  { %v1654_v23 = vmax.f32 %v1573_v19, 0.0  ;;  %3097 = vmatmul.mubr.msk.bf16.gmra.mrb[88].mxu0 %vm1809_vm3, %v4667_v44  ;;  %v4821_v19 = vpop.permute.xlu1 %1776 }
 0x29a   :  { %v1693_v24 = vpack.c.bf16 %v1653_v21, %v1643_v20  ;;  %2386 = vmatprep.mubr.bf16.mxu0 %v3626_v29 }
 0x29b   :  { %v1694_v61 = vpack.c.bf16 %v1654_v23, %v1644_v22 }
 0x29d   :  { %2150 = vmatprep.subr.bf16.mxu1 %v1694_v61 }
 0x29e   :  { %2151 = vmatpush1.bf16.msra.mxu1 %v1693_v24 }
 0x2a1   :  { %3098 = vmatmul.mubr.msk.bf16.vlgmr.msra.gmra.mrb[104].mxu1 %vm1809_vm3, %v4598_v52 }
 0x2a2   :  { %2182 = vmatprep.mubr.bf16.mxu1 %v3626_v29 }
 0x2a9   :  { %3099 = vmatmul.mubr.msk.bf16.gmra.mrb[108].mxu1 %vm1809_vm3, %v4610_v9 }
 0x2aa   :  { %2188 = vmatprep.mubr.bf16.mxu1 %v3626_v29 }
 0x2b1   :  { %3100 = vmatmul.mubr.msk.bf16.gmra.mrb[112].mxu1 %vm1809_vm3, %v4622_v26 }
 0x2b2   :  { %2194 = vmatprep.mubr.bf16.mxu1 %v3626_v29 }
 0x2b9   :  { %3101 = vmatmul.mubr.msk.bf16.gmra.mrb[116].mxu1 %vm1809_vm3, %v4634_v37 }
 0x2ba   :  { %2200 = vmatprep.mubr.bf16.mxu1 %v3626_v29 }
 0x2c1   :  { %3102 = vmatmul.mubr.msk.bf16.gmra.mrb[120].mxu1 %vm1809_vm3, %v4648_v11 }
 0x2c2   :  { %2210 = vmatprep.mubr.bf16.mxu1 %v3626_v29 }
 0x2c9   :  { %3103 = vmatmul.mubr.msk.bf16.gmra.mrb[124].mxu1 %vm1809_vm3, %v4667_v44 }
 0x2f4   :  { %v4780_v27 = vpop.f32.mrb[56].mxu1 }
 0x2f5   :  { %v4782_v33 = vpop.f32.mrb[57].mxu1 }
 0x2f6   :  { %v4784_v52 = vpop.f32.mrb[58].mxu1 }
 0x2f7   :  { %v4786_v9 = vpop.f32.mrb[59].mxu1 }
 0x2fc   :  { %v4788_v26 = vpop.f32.mrb[60].mxu1 }
 0x2fd   :  { %v4790_v37 = vpop.f32.mrb[61].mxu1 }
 0x2fe   :  { %v4792_v59 = vpop.f32.mrb[62].mxu1 }
 0x2ff   :  { %v4794_v11 = vpop.f32.mrb[63].mxu1 }
 0x304   :  { %v4796_v25 = vpop.f32.mrb[64].mxu1 }
 0x305   :  { %v4798_v50 = vpop.f32.mrb[65].mxu1 }
 0x306   :  { %v4800_v44 = vpop.f32.mrb[66].mxu1 }
 0x307   :  { %v4802_v28 = vpop.f32.mrb[67].mxu1 }
 0x30c   :  { %v4804_v4 = vpop.f32.mrb[68].mxu1 }
 0x30d   :  { %v4806_v51 = vpop.f32.mrb[69].mxu1 }
 0x30e   :  { %v4808_v31 = vpop.f32.mrb[70].mxu1 }
 0x30f   :  { %v4810_v32 = vpop.f32.mrb[71].mxu1 }
 0x314   :  { %v1947_v34 = vpop.f32.mrb[44].mxu0  ;;  %v1902_v55 = vpop.f32.mrb[72].mxu1 }
 0x315   :  { %v1948_v35 = vpop.f32.mrb[45].mxu0  ;;  %v1903_v36 = vpop.f32.mrb[73].mxu1 }
 0x316   :  { %v1949_v30 = vpop.f32.mrb[46].mxu0  ;;  %v1904_v38 = vpop.f32.mrb[74].mxu1 }
 0x317   :  { %v1950_v39 = vpop.f32.mrb[47].mxu0  ;;  %v1905_v45 = vpop.f32.mrb[75].mxu1 }
 0x31c   :  { %v1953_v10 = vpop.f32.mrb[48].mxu0  ;;  %v1908_v40 = vpop.f32.mrb[76].mxu1 }
 0x31d   :  { %v1954_v41 = vpop.f32.mrb[49].mxu0  ;;  %v1909_v42 = vpop.f32.mrb[77].mxu1 }
 0x31e   :  { %v1955_v43 = vpop.f32.mrb[50].mxu0  ;;  %v1910_v46 = vpop.f32.mrb[78].mxu1 }
 0x31f   :  { %v1956_v48 = vpop.f32.mrb[51].mxu0  ;;  %v1911_v49 = vpop.f32.mrb[79].mxu1 }
 0x324   :  { %v1959_v53 = vpop.f32.mrb[52].mxu0 }
 0x325   :  { %v1960_v54 = vpop.f32.mrb[53].mxu0 }
 0x326   :  { %v1961_v60 = vpop.f32.mrb[54].mxu0 }
 0x327   :  { %v1962_v56 = vpop.f32.mrb[55].mxu0 }
 0x32c   :  { %v1965_v57 = vpop.f32.mrb[56].mxu0 }
 0x32d   :  { %v1966_v1 = vpop.f32.mrb[57].mxu0 }
 0x32e   :  { %v1967_v58 = vpop.f32.mrb[58].mxu0 }
 0x32f   :  { %v1968_v62 = vpop.f32.mrb[59].mxu0 }
 0x334   :  { %v1971_v2 = vpop.f32.mrb[60].mxu0  ;;  %v2024_v3 = vpop.f32.mrb[80].mxu1 }
 0x335   :  { %v1972_v5 = vadd.f32 %v1971_v2, %v4812_v63  ;;  %v1973_v6 = vpop.f32.mrb[61].mxu0  ;;  %v2025_v7 = vpop.f32.mrb[81].mxu1 }
 0x336   :  { %v1975_v8 = vpop.f32.mrb[62].mxu0  ;;  %v2026_v12 = vpop.f32.mrb[82].mxu1  ;;  %v1974_v13 = vadd.f32 %v1973_v6, %v4812_v63 }
 0x337   :  { %v2237_v47 = vmax.f32 %v1972_v5, 0.0  ;;  %v1976_v14 = vadd.f32 %v1975_v8, %v4814_v0  ;;  %v1977_v15 = vpop.f32.mrb[63].mxu0  ;;  %v2027_v17 = vpop.f32.mrb[83].mxu1 }
 0x338   :  { %v2238_v20 = vmax.f32 %v1974_v13, 0.0  ;;  %v1978_v21 = vadd.f32 %v1977_v15, %v4814_v0 }
 0x339   :  { %v2245_v16 = vmax.f32 %v1976_v14, 0.0  ;;  %2533 = vmax.xlane.f32.xlu0 %v2237_v47 }
 0x33a   :  { %v2246_v36 = vmax.f32 %v1978_v21, 0.0 }
 0x33b   :  { %2535 = vmax.xlane.f32.xlu1 %v2245_v16 }
 0x33c   :  { %v1981_v22 = vpop.f32.mrb[64].mxu0  ;;  %v2030_v23 = vpop.f32.mrb[84].mxu1 }
 0x33d   :  { %v1982_v24 = vadd.f32 %v1981_v22, %v4819_v18  ;;  %v1983_v61 = vpop.f32.mrb[65].mxu0  ;;  %2541 = vmax.xlane.f32.xlu0 %v2238_v20  ;;  %v2031_v34 = vpop.f32.mrb[85].mxu1 }
 0x33e   :  { %v1985_v55 = vpop.f32.mrb[66].mxu0  ;;  %v2032_v35 = vpop.f32.mrb[86].mxu1  ;;  %v1984_v38 = vadd.f32 %v1983_v61, %v4819_v18 }
 0x33f   :  { %v2253_v30 = vmax.f32 %v1982_v24, 0.0  ;;  %v1986_v39 = vadd.f32 %v1985_v55, %v4821_v19  ;;  %v1987_v45 = vpop.f32.mrb[67].mxu0  ;;  %v2033_v10 = vpop.f32.mrb[87].mxu1 }
 0x340   :  { %v2254_v40 = vmax.f32 %v1984_v38, 0.0  ;;  %v1988_v42 = vadd.f32 %v1987_v45, %v4821_v19 }
 0x341   :  { %2537 = vmax.xlane.f32.xlu1 %v2253_v30  ;;  %2543 = vmax.xlane.f32.xlu0 %v2246_v36  ;;  %v2261_v41 = vmax.f32 %v1986_v39, 0.0 }
 0x342   :  { %v2262_v60 = vmax.f32 %v1988_v42, 0.0 }
 0x344   :  { %v2036_v43 = vpop.f32.mrb[88].mxu1  ;;  %v2101_v46 = vpop.f32.mrb[68].mxu0 }
 0x345   :  { %2545 = vmax.xlane.f32.xlu1 %v2254_v40  ;;  %2539 = vmax.xlane.f32.xlu0 %v2261_v41  ;;  %v2037_v48 = vpop.f32.mrb[89].mxu1  ;;  %v2102_v49 = vpop.f32.mrb[69].mxu0 }
 0x346   :  { %v2038_v53 = vpop.f32.mrb[90].mxu1  ;;  %v2103_v54 = vpop.f32.mrb[70].mxu0 }
 0x347   :  { %v2039_v56 = vpop.f32.mrb[91].mxu1  ;;  %v2104_v57 = vpop.f32.mrb[71].mxu0 }
 0x349   :  { %2547 = vmax.xlane.f32.xlu0 %v2262_v60 }
 0x34c   :  { %v2042_v1 = vpop.f32.mrb[92].mxu1  ;;  %v2107_v58 = vpop.f32.mrb[72].mxu0 }
 0x34d   :  { %v2043_v62 = vpop.f32.mrb[93].mxu1  ;;  %v2108_v2 = vpop.f32.mrb[73].mxu0 }
 0x34e   :  { %v2044_v3 = vpop.f32.mrb[94].mxu1  ;;  %v2109_v5 = vpop.f32.mrb[74].mxu0 }
 0x34f   :  { %v2045_v6 = vpop.f32.mrb[95].mxu1  ;;  %v2110_v7 = vpop.f32.mrb[75].mxu0 }
 0x354   :  { %v2048_v8 = vpop.f32.mrb[96].mxu1  ;;  %v2113_v12 = vpop.f32.mrb[76].mxu0 }
 0x355   :  { %v2049_v47 = vadd.f32 %v2048_v8, %v4812_v63  ;;  %v2050_v13 = vpop.f32.mrb[97].mxu1  ;;  %v2114_v14 = vpop.f32.mrb[77].mxu0 }
 0x356   :  { %v2052_v15 = vpop.f32.mrb[98].mxu1  ;;  %v2115_v17 = vpop.f32.mrb[78].mxu0  ;;  %v2051_v20 = vadd.f32 %v2050_v13, %v4812_v63 }
 0x357   :  { %v2239_v16 = vmax.f32 %v2049_v47, 0.0  ;;  %v2053_v21 = vadd.f32 %v2052_v15, %v4814_v0  ;;  %v2054_v22 = vpop.f32.mrb[99].mxu1  ;;  %v2116_v23 = vpop.f32.mrb[79].mxu0 }
 0x358   :  { %v2055_v61 = vadd.f32 %v2054_v22, %v4814_v0  ;;  %v2240_v34 = vmax.f32 %v2051_v20, 0.0 }
 0x359   :  { %v2247_v24 = vmax.f32 %v2053_v21, 0.0  ;;  %2549 = vmax.xlane.f32.xlu1 %v2239_v16 }
 0x35a   :  { %v2248_v36 = vmax.f32 %v2055_v61, 0.0 }
 0x35b   :  { %2551 = vmax.xlane.f32.xlu0 %v2247_v24 }
 0x35c   :  { %v2058_v55 = vpop.f32.mrb[100].mxu1  ;;  %v2119_v35 = vpop.f32.mrb[80].mxu0 }
 0x35d   :  { %v2059_v30 = vadd.f32 %v2058_v55, %v4819_v18  ;;  %v2060_v38 = vpop.f32.mrb[101].mxu1  ;;  %2557 = vmax.xlane.f32.xlu1 %v2240_v34  ;;  %v2120_v39 = vpop.f32.mrb[81].mxu0 }
 0x35e   :  { %v2062_v45 = vpop.f32.mrb[102].mxu1  ;;  %v2121_v10 = vpop.f32.mrb[82].mxu0  ;;  %v2061_v41 = vadd.f32 %v2060_v38, %v4819_v18 }
 0x35f   :  { %v2255_v40 = vmax.f32 %v2059_v30, 0.0  ;;  %v2063_v42 = vadd.f32 %v2062_v45, %v4821_v19  ;;  %v2064_v43 = vpop.f32.mrb[103].mxu1  ;;  %2559 = vmax.xlane.f32.xlu0 %v2248_v36  ;;  %v2122_v46 = vpop.f32.mrb[83].mxu0 }
 0x360   :  { %v2065_v49 = vadd.f32 %v2064_v43, %v4821_v19  ;;  %v2256_v53 = vmax.f32 %v2061_v41, 0.0 }
 0x361   :  { %v2263_v48 = vmax.f32 %v2063_v42, 0.0  ;;  %2553 = vmax.xlane.f32.xlu1 %v2255_v40 }
 0x362   :  { %v2264_v60 = vmax.f32 %v2065_v49, 0.0 }
 0x363   :  { %2555 = vmax.xlane.f32.xlu0 %v2263_v48 }
 0x364   :  { %v2125_v54 = vpop.f32.mrb[84].mxu0 }
 0x365   :  { %v2126_v56 = vadd.f32 %v2125_v54, %v4812_v63  ;;  %v2127_v57 = vpop.f32.mrb[85].mxu0  ;;  %2561 = vmax.xlane.f32.xlu1 %v2256_v53 }
 0x366   :  { %v2129_v1 = vpop.f32.mrb[86].mxu0  ;;  %v2128_v62 = vadd.f32 %v2127_v57, %v4812_v63 }
 0x367   :  { %v2241_v58 = vmax.f32 %v2126_v56, 0.0  ;;  %v2130_v2 = vadd.f32 %v2129_v1, %v4814_v0  ;;  %v2131_v3 = vpop.f32.mrb[87].mxu0  ;;  %2563 = vmax.xlane.f32.xlu0 %v2264_v60 }
 0x368   :  { %v2132_v6 = vadd.f32 %v2131_v3, %v4814_v0  ;;  %v2242_v7 = vmax.f32 %v2128_v62, 0.0 }
 0x369   :  { %v2249_v5 = vmax.f32 %v2130_v2, 0.0  ;;  %2565 = vmax.xlane.f32.xlu1 %v2241_v58 }
 0x36a   :  { %v2250_v12 = vmax.f32 %v2132_v6, 0.0 }
 0x36b   :  { %2567 = vmax.xlane.f32.xlu0 %v2249_v5 }
 0x36c   :  { %v2135_v8 = vpop.f32.mrb[88].mxu0 }
 0x36d   :  { %v2136_v47 = vadd.f32 %v2135_v8, %v4819_v18  ;;  %v2137_v13 = vpop.f32.mrb[89].mxu0  ;;  %2573 = vmax.xlane.f32.xlu1 %v2242_v7 }
 0x36e   :  { %v2139_v14 = vpop.f32.mrb[90].mxu0  ;;  %v2138_v17 = vadd.f32 %v2137_v13, %v4819_v18 }
 0x36f   :  { %v2257_v15 = vmax.f32 %v2136_v47, 0.0  ;;  %v2140_v16 = vadd.f32 %v2139_v14, %v4821_v19  ;;  %v2141_v20 = vpop.f32.mrb[91].mxu0  ;;  %2575 = vmax.xlane.f32.xlu0 %v2250_v12 }
 0x370   :  { %v2142_v22 = vadd.f32 %v2141_v20, %v4821_v19  ;;  %v2258_v23 = vmax.f32 %v2138_v17, 0.0  ;;  %v1722_v17 = vpop.permute.xlu0 %1721 }
 0x371   :  { %v2265_v21 = vmax.f32 %v2140_v16, 0.0  ;;  %2569 = vmax.xlane.f32.xlu1 %v2257_v15  ;;  %v1865_v16 = vadd.f32 %v4782_v33, %v1722_v17 }
 0x372   :  { %v2266_v61 = vmax.f32 %v2142_v22, 0.0 }
 0x373   :  { %2571 = vmax.xlane.f32.xlu0 %v2265_v21  ;;  %v1727_v21 = vpop.permute.xlu1 %1726 }
 0x374   :  { %v2178_v24 = vpop.f32.mrb[104].mxu1  ;;  %v1869_v22 = vadd.f32 %v4786_v9, %v1727_v21 }
 0x375   :  { %v2179_v34 = vpop.f32.mrb[105].mxu1  ;;  %2577 = vmax.xlane.f32.xlu1 %v2258_v23  ;;  %v2222_v24 = vmax.f32 %v1865_v16, 0.0  ;;  %v2426_v16 = vld [vmem:[%s5024_s3 + $0xf8] sm:$0xff] }
 0x376   :  { %v2180_v55 = vpop.f32.mrb[106].mxu1  ;;  %v2224_v34 = vmax.f32 %v1869_v22, 0.0 }
 0x377   :  { %v2181_v35 = vpop.f32.mrb[107].mxu1  ;;  %2579 = vmax.xlane.f32.xlu0 %v2266_v61  ;;  %v1867_v61 = vadd.f32 %v4784_v52, %v1727_v21  ;;  %v1737_v33 = vpop.permute.xlu1 %1736 }
 0x37c   :  { %v2184_v36 = vpop.f32.mrb[108].mxu1 }
 0x37d   :  { %v2185_v30 = vpop.f32.mrb[109].mxu1  ;;  %v2223_v36 = vmax.f32 %v1867_v61, 0.0 }
 0x37e   :  { %v2186_v38 = vpop.f32.mrb[110].mxu1  ;;  %v1879_v30 = vadd.f32 %v4794_v11, %v1737_v33 }
 0x37f   :  { %v2187_v39 = vpop.f32.mrb[111].mxu1 }
 0x380   :  { %v2228_v39 = vmax.f32 %v1879_v30, 0.0 }
 0x384   :  { %v2190_v45 = vpop.f32.mrb[112].mxu1 }
 0x385   :  { %v2191_v10 = vpop.f32.mrb[113].mxu1 }
 0x386   :  { %v2192_v40 = vpop.f32.mrb[114].mxu1 }
 0x387   :  { %v2193_v41 = vpop.f32.mrb[115].mxu1 }
 0x38c   :  { %v2196_v42 = vpop.f32.mrb[116].mxu1 }
 0x38d   :  { %v2197_v43 = vpop.f32.mrb[117].mxu1 }
 0x38e   :  { %v2198_v46 = vpop.f32.mrb[118].mxu1 }
 0x38f   :  { %v2199_v48 = vpop.f32.mrb[119].mxu1  ;;  %v3594_v46 = vld [vmem:[%s5023_s2 + $0x80] sm:$0xff]  }
 0x390   :  { %3325 = vmatprep.mubr.msk.bf16.mxu1 %vm1197_vm2, %v3594_v46 }
 0x394   :  { %v2202_v49 = vpop.f32.mrb[120].mxu1 }
 0x395   :  { %v2203_v53 = vadd.f32 %v2202_v49, %v4812_v63  ;;  %v2204_v54 = vpop.f32.mrb[121].mxu1 }
 0x396   :  { %v2206_v60 = vpop.f32.mrb[122].mxu1  ;;  %v2205_v57 = vadd.f32 %v2204_v54, %v4812_v63 }
 0x397   :  { %v2243_v56 = vmax.f32 %v2203_v53, 0.0  ;;  %v2207_v1 = vadd.f32 %v2206_v60, %v4814_v0  ;;  %v2208_v58 = vpop.f32.mrb[123].mxu1 }
 0x398   :  { %v2209_v2 = vadd.f32 %v2208_v58, %v4814_v0  ;;  %v2244_v3 = vmax.f32 %v2205_v57, 0.0  ;;  %v2313_v58 = vld [vmem:[%s5024_s3 + $0xc0] sm:$0xff] }
 0x399   :  { %v2251_v62 = vmax.f32 %v2207_v1, 0.0  ;;  %2581 = vmax.xlane.f32.xlu1 %v2243_v56 }
 0x39a   :  { %v2252_v6 = vmax.f32 %v2209_v2, 0.0  ;;  %v2315_v2 = vld [vmem:[%s5024_s3 + $0xd0] sm:$0xff] }
 0x39b   :  { %2583 = vmax.xlane.f32.xlu0 %v2251_v62  ;;  %v2314_v62 = vld [vmem:[%s5024_s3 + $0xc8] sm:$0xff] }
 0x39c   :  { %v2212_v5 = vpop.f32.mrb[124].mxu1 }
 0x39d   :  { %v2213_v7 = vadd.f32 %v2212_v5, %v4819_v18  ;;  %v2214_v8 = vpop.f32.mrb[125].mxu1  ;;  %2589 = vmax.xlane.f32.xlu1 %v2244_v3  ;;  %v2316_v3 = vld [vmem:[%s5024_s3 + $0xd8] sm:$0xff] }
 0x39e   :  { %v2216_v12 = vpop.f32.mrb[126].mxu1  ;;  %v2215_v13 = vadd.f32 %v2214_v8, %v4819_v18  ;;  %v1863_v18 = vadd.f32 %v4780_v27, %v1722_v17  ;;  %v1877_v27 = vadd.f32 %v4792_v59, %v1737_v33  ;;  %v2425_v17 = vld [vmem:[%s5024_s3 + $0xf0] sm:$0xff] }
 0x39f   :  { %v2259_v47 = vmax.f32 %v2213_v7, 0.0  ;;  %v2217_v63 = vadd.f32 %v2216_v12, %v4821_v19  ;;  %v2218_v14 = vpop.f32.mrb[127].mxu1  ;;  %2591 = vmax.xlane.f32.xlu0 %v2252_v6  ;;  %v2736_v6 = vld [vmem:[%s5024_s3 + $0x120] sm:$0xff]  ;;  %v2737_v7 = vld [vmem:[%s5024_s3 + $0x128] sm:$0xff] }
 0x3a0   :  { %v2219_v0 = vadd.f32 %v2218_v14, %v4821_v19  ;;  %v2260_v20 = vmax.f32 %v2215_v13, 0.0  ;;  %v1732_v19 = vpop.permute.xlu0 %1731  ;;  %v2221_v55 = vmax.f32 %v1863_v18, 0.0  ;;  %v2227_v40 = vmax.f32 %v1877_v27, 0.0  ;;  %v2739_v13 = vld [vmem:[%s5024_s3 + $0x138] sm:$0xff]  ;;  %v2423_v14 = vld [vmem:[%s5024_s3 + $0xe0] sm:$0xff] }
 0x3a1   :  { %v2267_v15 = vmax.f32 %v2217_v63, 0.0  ;;  %2585 = vmax.xlane.f32.xlu1 %v2259_v47  ;;  %v1875_v35 = vadd.f32 %v4790_v37, %v1732_v19  ;;  %v1873_v9 = vadd.f32 %v4788_v26, %v1732_v19  ;;  %v1747_v37 = vpop.permute.xlu1 %1746  ;;  %v2738_v47 = vld [vmem:[%s5024_s3 + $0x130] sm:$0xff] }
 0x3a2   :  { %v2268_v23 = vmax.f32 %v2219_v0, 0.0  ;;  %v1889_v41 = vadd.f32 %v4802_v28, %v1747_v37  ;;  %v1887_v26 = vadd.f32 %v4800_v44, %v1747_v37 }
 0x3a3   :  { %2587 = vmax.xlane.f32.xlu0 %v2267_v15  ;;  %v2226_v38 = vmax.f32 %v1875_v35, 0.0  ;;  %v2225_v45 = vmax.f32 %v1873_v9, 0.0  ;;  %v2424_v15 = vld [vmem:[%s5024_s3 + $0xe8] sm:$0xff] }
 0x3a4   :  { %v1742_v52 = vpop.permute.xlu0 %1741  ;;  %v2232_v43 = vmax.f32 %v1889_v41, 0.0  ;;  %v2231_v28 = vmax.f32 %v1887_v26, 0.0 }
 0x3a5   :  { %2593 = vmax.xlane.f32.xlu1 %v2260_v20  ;;  %v1885_v10 = vadd.f32 %v4798_v50, %v1742_v52  ;;  %v1883_v11 = vadd.f32 %v4796_v25, %v1742_v52  ;;  %v1757_v49 = vpop.permute.xlu1 %1756 }
 0x3a6   :  { %v1899_v25 = vadd.f32 %v4810_v32, %v1757_v49  ;;  %v1897_v54 = vadd.f32 %v4808_v31, %v1757_v49  ;;  %v2638_v31 = vld [vmem:[%s5024_s3 + $0x108] sm:$0xff]  ;;  %v2640_v32 = vld [vmem:[%s5024_s3 + $0x118] sm:$0xff] }
 0x3a7   :  { %2595 = vmax.xlane.f32.xlu0 %v2268_v23  ;;  %v2230_v42 = vmax.f32 %v1885_v10, 0.0  ;;  %v2229_v50 = vmax.f32 %v1883_v11, 0.0 }
 0x3a8   :  { %v1752_v59 = vpop.permute.xlu0 %1751  ;;  %v2236_v60 = vmax.f32 %v1899_v25, 0.0  ;;  %v2235_v57 = vmax.f32 %v1897_v54, 0.0 }
 0x3a9   :  { %2285 = vmax.xlane.f32.xlu1 %v2222_v24  ;;  %v1895_v48 = vadd.f32 %v4806_v51, %v1752_v59  ;;  %v1893_v44 = vadd.f32 %v4804_v4, %v1752_v59  ;;  %v2637_v51 = vld [vmem:[%s5024_s3 + $0x100] sm:$0xff]  ;;  %v2639_v4 = vld [vmem:[%s5024_s3 + $0x110] sm:$0xff] }
 0x3ab   :  { %2287 = vmax.xlane.f32.xlu0 %v2224_v34  ;;  %v2234_v53 = vmax.f32 %v1895_v48, 0.0  ;;  %v2233_v56 = vmax.f32 %v1893_v44, 0.0 }
 0x3ad   :  { %2269 = vmax.xlane.f32.xlu1 %v2221_v55 }
 0x3af   :  { %2271 = vmax.xlane.f32.xlu0 %v2223_v36 }
 0x3b1   :  { %2289 = vmax.xlane.f32.xlu1 %v2226_v38 }
 0x3b3   :  { %2291 = vmax.xlane.f32.xlu0 %v2228_v39 }
 0x3b5   :  { %2273 = vmax.xlane.f32.xlu1 %v2225_v45 }
 0x3b7   :  { %2275 = vmax.xlane.f32.xlu0 %v2227_v40 }
 0x3b9   :  { %2293 = vmax.xlane.f32.xlu1 %v2230_v42 }
 0x3bb   :  { %2295 = vmax.xlane.f32.xlu0 %v2232_v43 }
 0x3bd   :  { %2277 = vmax.xlane.f32.xlu1 %v2229_v50 }
 0x3bf   :  { %2279 = vmax.xlane.f32.xlu0 %v2231_v28 }
 0x3c1   :  { %2297 = vmax.xlane.f32.xlu1 %v2234_v53 }
 0x3c3   :  { %2299 = vmax.xlane.f32.xlu0 %v2236_v60 }
 0x3c5   :  { %2281 = vmax.xlane.f32.xlu1 %v2233_v56 }
 0x3c6   :  { %v2534_v1 = vpop.xlane.xlu0 %2533 }
 0x3c7   :  { %2283 = vmax.xlane.f32.xlu0 %v2235_v57 }
 0x3c8   :  { %v2536_v8 = vpop.xlane.xlu1 %2535 }
 0x3ca   :  { %v2542_v5 = vpop.xlane.xlu0 %2541 }
 0x3cb   :  { %v2598_v45 = vsel %vm2597_vm4, %v2534_v1, %v2542_v5 }
 0x3ce   :  { %v2544_v12 = vpop.xlane.xlu0 %2543  ;;  %v2538_v63 = vpop.xlane.xlu1 %2537 }
 0x3cf   :  { %v2599_v10 = vsel %vm2597_vm4, %v2536_v8, %v2544_v12 }
 0x3d2   :  { %v2540_v0 = vpop.xlane.xlu0 %2539  ;;  %v2546_v20 = vpop.xlane.xlu1 %2545 }
 0x3d3   :  { %v2600_v60 = vsel %vm2597_vm4, %v2538_v63, %v2546_v20 }
 0x3d6   :  { %2643 = vperm.xlu1 %3583, %v2637_v51   ;;  %v2548_v21 = vpop.xlane.xlu0 %2547 }
 0x3d7   :  { %v2601_v56 = vsel %vm2597_vm4, %v2540_v0, %v2548_v21 }
 0x3da   :  { %2653 = vperm.xlu1 %3583, %v2639_v4  }
 0x3dd   :  { %2648 = vperm.xlu0 %3582, %v2638_v31  }
 0x3de   :  { %2658 = vperm.xlu1 %3583, %v2640_v32  }
 0x3e1   :  { %2319 = vperm.xlu0 %3582, %v2313_v58  }
 0x3e2   :  { %2324 = vperm.xlu1 %3583, %v2314_v62  }
 0x3e5   :  { %2329 = vperm.xlu0 %3582, %v2315_v2  }
 0x3e6   :  { %2334 = vperm.xlu1 %3583, %v2316_v3   ;;  %v2550_v22 = vpop.xlane.xlu1 %2549 }
 0x3e7   :  { %v2603_v37 = vsel %vm2602_vm5, %v2598_v45, %v2550_v22  ;;  %v3597_v45 = vld [vmem:[%s5023_s2 + $0x68] sm:$0xff]  }
 0x3e8   :  { %v2552_v23 = vpop.xlane.xlu0 %2551 }
 0x3e9   :  { %2742 = vperm.xlu0 %3582, %v2736_v6   ;;  %v2604_v40 = vsel %vm2602_vm5, %v2599_v10, %v2552_v23  ;;  %v3598_v10 = vld [vmem:[%s5023_s2 + $0x90] sm:$0xff]  }
 0x3ea   :  { %2747 = vperm.xlu1 %3583, %v2737_v7   ;;  %v2558_v18 = vpop.xlane.xlu1 %2557 }
 0x3eb   :  { %v2608_v11 = vsel %vm2607_vm6, %v2603_v37, %v2558_v18 }
 0x3ec   :  { %v2560_v24 = vpop.xlane.xlu0 %2559 }
 0x3ed   :  { %2752 = vperm.xlu0 %3582, %v2738_v47   ;;  %v2609_v42 = vsel %vm2607_vm6, %v2604_v40, %v2560_v24 }
 0x3ee   :  { %2757 = vperm.xlu1 %3583, %v2739_v13   ;;  %v2554_v61 = vpop.xlane.xlu1 %2553 }
 0x3ef   :  { %v2605_v57 = vsel %vm2602_vm5, %v2600_v60, %v2554_v61 }
 0x3f0   :  { %v2556_v34 = vpop.xlane.xlu0 %2555 }
 0x3f1   :  { %2429 = vperm.xlu0 %3582, %v2423_v14   ;;  %v2606_v51 = vsel %vm2602_vm5, %v2601_v56, %v2556_v34  ;;  %v3595_v14 = vld [vmem:[%s5023_s2 + $0x88] sm:$0xff]   ;;  %v3599_v56 = vld [vmem:[%s5023_s2 + $0x98] sm:$0xff]  }
 0x3f2   :  { %2434 = vperm.xlu1 %3583, %v2424_v15   ;;  %v2562_v19 = vpop.xlane.xlu1 %2561 }
 0x3f3   :  { %v2610_v31 = vsel %vm2607_vm6, %v2605_v57, %v2562_v19 }
 0x3f4   :  { %v2564_v55 = vpop.xlane.xlu0 %2563 }
 0x3f5   :  { %2439 = vperm.xlu0 %3582, %v2425_v17   ;;  %v2611_v32 = vsel %vm2607_vm6, %v2606_v51, %v2564_v55 }
 0x3f6   :  { %2444 = vperm.xlu1 %3583, %v2426_v16   ;;  %v2566_v35 = vpop.xlane.xlu1 %2565 }
 0x3f7   :  { %v2612_v26 = vsel %vm197_vm0, %v2608_v11, %v2566_v35 }
 0x3f8   :  { %v2568_v33 = vpop.xlane.xlu0 %2567 }
 0x3f9   :  { %v2613_v43 = vsel %vm197_vm0, %v2609_v42, %v2568_v33 }
 0x3fa   :  { %v2574_v36 = vpop.xlane.xlu1 %2573 }
 0x3fb   :  { %v2617_v46 = vsel %vm2616_vm7, %v2612_v26, %v2574_v36 }
 0x3fc   :  { %v2576_v30 = vpop.xlane.xlu0 %2575 }
 0x3fd   :  { %v2618_v50 = vsel %vm2616_vm7, %v2613_v43, %v2576_v30 }
 0x3fe   :  { %v2570_v9 = vpop.xlane.xlu1 %2569 }
 0x3ff   :  { %v2614_v1 = vsel %vm197_vm0, %v2610_v31, %v2570_v9 }
 0x400   :  { %v2572_v38 = vpop.xlane.xlu0 %2571 }
 0x401   :  { %v2615_v58 = vsel %vm197_vm0, %v2611_v32, %v2572_v38 }
 0x402   :  { %v2578_v27 = vpop.xlane.xlu1 %2577 }
 0x403   :  { %v2619_v2 = vsel %vm2616_vm7, %v2614_v1, %v2578_v27 }
 0x404   :  { %v2580_v39 = vpop.xlane.xlu0 %2579 }
 0x405   :  { %v2620_v3 = vsel %vm2616_vm7, %v2615_v58, %v2580_v39 }
 0x426   :  { %v2582_v52 = vpop.xlane.xlu1 %2581 }
 0x427   :  { %v2622_v48 = vsel %vm2621_vm8, %v2617_v46, %v2582_v52  ;;  %v3596_v52 = vld [vmem:[%s5023_s2 + $0x60] sm:$0xff]  }
 0x428   :  { %v2584_v41 = vpop.xlane.xlu0 %2583 }
 0x429   :  { %v2623_v49 = vsel %vm2621_vm8, %v2618_v50, %v2584_v41 }
 0x42a   :  { %v2590_v59 = vpop.xlane.xlu1 %2589 }
 0x42b   :  { %v2627_v25 = vsel %vm2626_vm9, %v2622_v48, %v2590_v59 }
 0x42c   :  { %v2592_v28 = vpop.xlane.xlu0 %2591 }
 0x42d   :  { %v2628_v44 = vsel %vm2626_vm9, %v2623_v49, %v2592_v28 }
 0x42e   :  { %v2631_v53 = vpack.c.bf16 %v2628_v44, %v2627_v25  ;;  %v2586_v54 = vpop.xlane.xlu1 %2585 }
 0x42f   :  { %v2624_v5 = vsel %vm2621_vm8, %v2619_v2, %v2586_v54 }
 0x430   :  { %v2588_v4 = vpop.xlane.xlu0 %2587  ;;  %3321 = vmatprep.subr.bf16.mxu1 %v2631_v53 }
 0x431   :  { %3322 = vmatpush3.bf16.msra.mxu1 %v2631_v53  ;;  %v2625_v6 = vsel %vm2621_vm8, %v2620_v3, %v2588_v4 }
 0x432   :  { %v2594_v62 = vpop.xlane.xlu1 %2593 }
 0x433   :  { %v2629_v8 = vsel %vm2626_vm9, %v2624_v5, %v2594_v62 }
 0x434   :  { %v2596_v7 = vpop.xlane.xlu0 %2595 }
 0x435   :  { %v2630_v12 = vsel %vm2626_vm9, %v2625_v6, %v2596_v7 }
 0x436   :  { %v2632_v47 = vpack.c.bf16 %v2630_v12, %v2629_v8  ;;  %v2286_v13 = vpop.xlane.xlu1 %2285 }
 0x438   :  { %3323 = vmatprep.subr.bf16.mxu1 %v2632_v47  ;;  %v2288_v63 = vpop.xlane.xlu0 %2287 }
 0x439   :  { %v2302_v15 = vpack.c.bf16 %v2288_v63, %v2286_v13  ;;  %3324 = vmatpush3.bf16.msra.mxu1 %v2632_v47 }
 0x43a   :  { %v2270_v0 = vpop.xlane.xlu1 %2269 }
 0x43b   :  { %2358 = vmatprep.subr.bf16.mxu0 %v2302_v15 }
 0x43c   :  { %3326 = vmatmul.mubr.msk.bf16.vlgmr.msra.gmra.mrb[128].mxu1 %vm1197_vm2, %v3595_v14  ;;  %v2272_v17 = vpop.xlane.xlu0 %2271 }
 0x43d   :  { %v2301_v16 = vpack.c.bf16 %v2272_v17, %v2270_v0  ;;  %3333 = vmatprep.mubr.msk.bf16.mxu1 %vm1197_vm2, %v3598_v10 }
 0x43e   :  { %v2290_v20 = vpop.xlane.xlu1 %2289 }
 0x43f   :  { %2359 = vmatpush1.bf16.msra.mxu0 %v2301_v16 }
 0x440   :  { %v2292_v21 = vpop.xlane.xlu0 %2291 }
 0x441   :  { %v2304_v22 = vpack.c.bf16 %v2292_v21, %v2290_v20 }
 0x442   :  { %v2274_v23 = vpop.xlane.xlu1 %2273 }
 0x443   :  { %2360 = vmatprep.subr.bf16.mxu0 %v2304_v22 }
 0x444   :  { %v2276_v18 = vpop.xlane.xlu0 %2275 }
 0x445   :  { %v2303_v24 = vpack.c.bf16 %v2276_v18, %v2274_v23 }
 0x446   :  { %v2294_v61 = vpop.xlane.xlu1 %2293 }
 0x447   :  { %2361 = vmatpush1.bf16.msra.mxu0 %v2303_v24 }
 0x448   :  { %v2296_v34 = vpop.xlane.xlu0 %2295 }
 0x449   :  { %v2306_v19 = vpack.c.bf16 %v2296_v34, %v2294_v61 }
 0x44a   :  { %v2278_v55 = vpop.xlane.xlu1 %2277 }
 0x44b   :  { %2362 = vmatprep.subr.bf16.mxu0 %v2306_v19 }
 0x44c   :  { %v2280_v35 = vpop.xlane.xlu0 %2279 }
 0x44d   :  { %v2305_v33 = vpack.c.bf16 %v2280_v35, %v2278_v55  ;;  %v3600_v55 = vld [vmem:[%s5023_s2 + $0x70] sm:$0xff]   ;;  %v3601_v35 = vld [vmem:[%s5023_s2 + $0x78] sm:$0xff]  }
 0x44e   :  { %v2298_v36 = vpop.xlane.xlu1 %2297 }
 0x44f   :  { %2363 = vmatpush1.bf16.msra.mxu0 %v2305_v33 }
 0x450   :  { %v2300_v30 = vpop.xlane.xlu0 %2299 }
 0x451   :  { %v2308_v9 = vpack.c.bf16 %v2300_v30, %v2298_v36 }
 0x452   :  { %v2282_v38 = vpop.xlane.xlu1 %2281 }
 0x453   :  { %2364 = vmatprep.subr.bf16.mxu0 %v2308_v9 }
 0x454   :  { %v2284_v27 = vpop.xlane.xlu0 %2283 }
 0x455   :  { %v2307_v39 = vpack.c.bf16 %v2284_v27, %v2282_v38 }
 0x456   :  { %v2644_v37 = vpop.permute.xlu1 %2643 }
 0x457   :  { %2365 = vmatpush1.bf16.msra.mxu0 %v2307_v39 }
 0x45a   :  { %3106 = vmatmul.mubr.msk.bf16.vlgmr.msra.gmra.mrb[92].mxu0 %vm2347_vm10, %v3596_v52  ;;  %v2654_v40 = vpop.permute.xlu1 %2653 }
 0x45b   :  { %2396 = vmatprep.mubr.bf16.mxu0 %v3626_v29 }
 0x45c   :  { %v2649_v46 = vpop.permute.xlu0 %2648 }
 0x45e   :  { %v2659_v26 = vpop.permute.xlu1 %2658 }
 0x460   :  { %v2320_v57 = vpop.permute.xlu0 %2319 }
 0x462   :  { %3107 = vmatmul.mubr.msk.bf16.gmra.mrb[96].mxu0 %vm2347_vm10, %v3597_v45  ;;  %v2325_v32 = vpop.permute.xlu1 %2324 }
 0x463   :  { %2495 = vmatprep.mubr.bf16.mxu0 %v3626_v29 }
 0x464   :  { %v2330_v47 = vpop.permute.xlu0 %2329 }
 0x466   :  { %v2335_v0 = vpop.permute.xlu1 %2334 }
 0x468   :  { %v2743_v33 = vpop.permute.xlu0 %2742 }
 0x46a   :  { %v2748_v36 = vpop.permute.xlu1 %2747 }
 0x46c   :  { %v2753_v30 = vpop.permute.xlu0 %2752 }
 0x46e   :  { %v2758_v39 = vpop.permute.xlu1 %2757 }
 0x50f   :  { %v3327_v41 = vpop.f32.mrb[128].mxu1 }
 0x510   :  { %v2720_v11 = vadd.f32 %v3327_v41, %v2654_v40  ;;  %v2711_v42 = vpop.f32.mrb[129].mxu1 }
 0x511   :  { %v2712_v43 = vadd.f32 %v2711_v42, %v2644_v37  ;;  %v3328_v59 = vpop.f32.mrb[130].mxu1 }
 0x512   :  { %v2723_v50 = vadd.f32 %v3328_v59, %v2659_v26  ;;  %v2714_v48 = vpop.f32.mrb[131].mxu1  ;;  %v2728_v28 = vmax.f32 %v2720_v11, 0.0  ;;  %v2430_v26 = vpop.permute.xlu0 %2429 }
 0x513   :  { %v2715_v49 = vadd.f32 %v2714_v48, %v2649_v46  ;;  %v2726_v44 = vmax.f32 %v2712_v43, 0.0 }
 0x514   :  { %v2729_v25 = vmax.f32 %v2723_v50, 0.0  ;;  %v2435_v50 = vpop.permute.xlu1 %2434 }
 0x515   :  { %v2727_v53 = vmax.f32 %v2715_v49, 0.0 }
 0x516   :  { %v2735_v54 = vpack.c.bf16 %v2729_v25, %v2728_v28 }
 0x517   :  { %v2734_v60 = vpack.c.bf16 %v2727_v53, %v2726_v44 }
 0x519   :  { %3329 = vmatprep.subr.bf16.mxu1 %v2734_v60 }
 0x51a   :  { %3330 = vmatpush3.bf16.msra.mxu1 %v2734_v60 }
 0x51b   :  { %3331 = vmatprep.subr.bf16.mxu1 %v2735_v54 }
 0x51e   :  { %3332 = vmatpush3.bf16.msra.mxu1 %v2735_v54 }
 0x521   :  { %3334 = vmatmul.mubr.msk.bf16.vlgmr.msra.gmra.mrb[132].mxu1 %vm1197_vm2, %v3599_v56 }
 0x52d   :  { %v2388_v51 = vpop.f32.mrb[92].mxu0 }
 0x52e   :  { %v2389_v4 = vadd.f32 %v2388_v51, %v2320_v57  ;;  %v2390_v31 = vpop.f32.mrb[93].mxu0 }
 0x52f   :  { %v2391_v1 = vadd.f32 %v2390_v31, %v2320_v57  ;;  %v2392_v58 = vpop.f32.mrb[94].mxu0  ;;  %v2440_v57 = vpop.permute.xlu0 %2439 }
 0x530   :  { %v2393_v62 = vadd.f32 %v2392_v58, %v2325_v32  ;;  %v2394_v2 = vpop.f32.mrb[95].mxu0  ;;  %v2407_v5 = vmax.f32 %v2389_v4, 0.0 }
 0x531   :  { %v2395_v3 = vadd.f32 %v2394_v2, %v2325_v32  ;;  %v2408_v7 = vmax.f32 %v2391_v1, 0.0  ;;  %v2445_v32 = vpop.permute.xlu1 %2444 }
 0x532   :  { %v2409_v6 = vmax.f32 %v2393_v62, 0.0 }
 0x533   :  { %v2410_v8 = vmax.f32 %v2395_v3, 0.0 }
 0x534   :  { %v2419_v12 = vpack.c.bf16 %v2409_v6, %v2407_v5 }
 0x535   :  { %v2420_v13 = vpack.c.bf16 %v2410_v8, %v2408_v7  ;;  %v2398_v63 = vpop.f32.mrb[96].mxu0 }
 0x536   :  { %v2399_v14 = vadd.f32 %v2398_v63, %v2330_v47  ;;  %v2400_v15 = vpop.f32.mrb[97].mxu0 }
 0x537   :  { %v2401_v17 = vadd.f32 %v2400_v15, %v2330_v47  ;;  %v2402_v16 = vpop.f32.mrb[98].mxu0  ;;  %2463 = vmatprep.subr.bf16.mxu0 %v2420_v13 }
 0x538   :  { %v2403_v20 = vadd.f32 %v2402_v16, %v2335_v0  ;;  %v2404_v21 = vpop.f32.mrb[99].mxu0  ;;  %2464 = vmatpush1.bf16.msra.mxu0 %v2419_v12  ;;  %v2411_v23 = vmax.f32 %v2399_v14, 0.0 }
 0x539   :  { %v2405_v22 = vadd.f32 %v2404_v21, %v2335_v0  ;;  %v2412_v24 = vmax.f32 %v2401_v17, 0.0 }
 0x53a   :  { %v2413_v18 = vmax.f32 %v2403_v20, 0.0 }
 0x53b   :  { %v2414_v61 = vmax.f32 %v2405_v22, 0.0 }
 0x53c   :  { %v2421_v34 = vpack.c.bf16 %v2413_v18, %v2411_v23 }
 0x53d   :  { %v2422_v19 = vpack.c.bf16 %v2414_v61, %v2412_v24 }
 0x53f   :  { %2465 = vmatprep.subr.bf16.mxu0 %v2422_v19 }
 0x540   :  { %2466 = vmatpush1.bf16.msra.mxu0 %v2421_v34 }
 0x543   :  { %3110 = vmatmul.mubr.msk.bf16.vlgmr.msra.gmra.mrb[100].mxu0 %vm1197_vm2, %v3600_v55 }
 0x544   :  { %2505 = vmatprep.mubr.bf16.mxu0 %v3626_v29 }
 0x54b   :  { %3111 = vmatmul.mubr.msk.bf16.gmra.mrb[104].mxu0 %vm1197_vm2, %v3601_v35 }
 0x5f4   :  { %v3335_v9 = vpop.f32.mrb[132].mxu1 }
 0x5f5   :  { %v2819_v38 = vadd.f32 %v3335_v9, %v2753_v30  ;;  %v2810_v27 = vpop.f32.mrb[133].mxu1 }
 0x5f6   :  { %v2811_v52 = vadd.f32 %v2810_v27, %v2743_v33  ;;  %v3336_v45 = vpop.f32.mrb[134].mxu1 }
 0x5f7   :  { %v2827_v10 = vmax.f32 %v2819_v38, 0.0  ;;  %v2822_v37 = vadd.f32 %v3336_v45, %v2758_v39  ;;  %v2813_v40 = vpop.f32.mrb[135].mxu1 }
 0x5f8   :  { %v2825_v41 = vmax.f32 %v2811_v52, 0.0  ;;  %v2814_v29 = vadd.f32 %v2813_v40, %v2748_v36 }
 0x5f9   :  { %2831 = vst.msk [vmem:[%s5026_s5 + $0x10] sm:$0xff] %vm197_vm0, %v2827_v10  ;;  %v2828_v11 = vmax.f32 %v2822_v37, 0.0 }
 0x5fa   :  { %2829 = vst.msk [vmem:[%s5026_s5] sm:$0xff] %vm197_vm0, %v2825_v41  ;;  %v2826_v42 = vmax.f32 %v2814_v29, 0.0  ;;  %2837 = vrot.lane.b32.xlu0 %v2825_v41, %s3627_s20 }
 0x5fb   :  { %2832 = vst.msk [vmem:[%s5026_s5 + $0x18] sm:$0xff] %vm197_vm0, %v2828_v11 }
 0x5fc   :  { %2830 = vst.msk [vmem:[%s5026_s5 + $0x8] sm:$0xff] %vm197_vm0, %v2826_v42  ;;  %2839 = vrot.lane.b32.xlu1 %v2826_v42, %s3627_s20 }
 0x5fe   :  { %2841 = vrot.lane.b32.xlu0 %v2827_v10, %s3627_s20 }
 0x600   :  { %2843 = vrot.lane.b32.xlu1 %v2828_v11, %s3627_s20 }
 0x616   :  { %v2497_v43 = vpop.f32.mrb[100].mxu0 }
 0x617   :  { %v2498_v59 = vadd.f32 %v2497_v43, %v2430_v26  ;;  %v2499_v46 = vpop.f32.mrb[101].mxu0 }
 0x618   :  { %v2500_v48 = vadd.f32 %v2499_v46, %v2430_v26  ;;  %v2501_v49 = vpop.f32.mrb[102].mxu0 }
 0x619   :  { %v2516_v28 = vmax.f32 %v2498_v59, 0.0  ;;  %v2502_v25 = vadd.f32 %v2501_v49, %v2435_v50  ;;  %v2503_v44 = vpop.f32.mrb[103].mxu0 }
 0x61a   :  { %v2517_v53 = vmax.f32 %v2500_v48, 0.0  ;;  %v2504_v54 = vadd.f32 %v2503_v44, %v2435_v50 }
 0x61b   :  { %2524 = vst [vmem:[#allocation2] sm:$0xff] %v2516_v28  ;;  %v2518_v60 = vmax.f32 %v2502_v25, 0.0 }
 0x61c   :  { %2529 = vst [vmem:[#allocation2 + $0x20] sm:$0xff] %v2517_v53  ;;  %v2519_v56 = vmax.f32 %v2504_v54, 0.0 }
 0x61d   :  { %2525 = vst [vmem:[#allocation2 + $0x8] sm:$0xff] %v2518_v60 }
 0x61e   :  { %2530 = vst [vmem:[#allocation2 + $0x28] sm:$0xff] %v2519_v56  ;;  %v2507_v51 = vpop.f32.mrb[104].mxu0 }
 0x61f   :  { %v2508_v4 = vadd.f32 %v2507_v51, %v2440_v57  ;;  %v2509_v31 = vpop.f32.mrb[105].mxu0 }
 0x620   :  { %v2510_v1 = vadd.f32 %v2509_v31, %v2440_v57  ;;  %v2511_v58 = vpop.f32.mrb[106].mxu0 }
 0x621   :  { %v2520_v62 = vmax.f32 %v2508_v4, 0.0  ;;  %v2512_v2 = vadd.f32 %v2511_v58, %v2445_v32  ;;  %v2513_v3 = vpop.f32.mrb[107].mxu0 }
 0x622   :  { %v2521_v5 = vmax.f32 %v2510_v1, 0.0  ;;  %v2514_v6 = vadd.f32 %v2513_v3, %v2445_v32 }
 0x623   :  { %2526 = vst [vmem:[#allocation2 + $0x10] sm:$0xff] %v2520_v62  ;;  %v2522_v7 = vmax.f32 %v2512_v2, 0.0 }
 0x624   :  { %2531 = vst [vmem:[#allocation2 + $0x30] sm:$0xff] %v2521_v5  ;;  %v2523_v8 = vmax.f32 %v2514_v6, 0.0 }
 0x625   :  { %2527 = vst [vmem:[#allocation2 + $0x18] sm:$0xff] %v2522_v7 }
 0x626   :  { %2532 = vst [vmem:[#allocation2 + $0x38] sm:$0xff] %v2523_v8 }
 0x627   :  { %3613 = shalt.err (!%p3610_p4)
}
 0x628   :  { %s3614_s30 = scalar_lea.hbm %s5025_s4, 1024 }
 0x629   :  { %p3615_p5 = scmp.ne.s32.totalorder %s5025_s4, %s3614_s30  ;;  %p3618_p6 = scmp.lt.u32.totalorder %s3614_s30, %s5025_s4 }
 0x62b   :  { %p3620_p7 = pnand %p3618_p6, %p3615_p5 }
 0x62d   :  { %3623 = shalt.err (!%p3620_p7)
}
 0x62e   :  { %s3629_s8 = smov 128   ;;  %s3630_s0 = smov 8  }
 0x62f   :  { %2865 = dma.vmem_to_hbm [thread:$0]  %s2860_s26, 1024, %s5025_s4, [#allocation3], %s3629_s8, %s3629_s8, %s3630_s0  }
 0x66c   :  { %v2838_v12 = vpop.permute.xlu0 %2837 }
 0x66d   :  { %3120 = vst.msk [vmem:[%s5026_s5 + $0x20] sm:$0xff] %vm197_vm0, %v2838_v12 }
 0x66e   :  { %v2840_v47 = vpop.permute.xlu1 %2839 }
 0x66f   :  { %3121 = vst.msk [vmem:[%s5026_s5 + $0x28] sm:$0xff] %vm197_vm0, %v2840_v47 }
 0x670   :  { %v2842_v13 = vpop.permute.xlu0 %2841 }
 0x671   :  { %3122 = vst.msk [vmem:[%s5026_s5 + $0x30] sm:$0xff] %vm197_vm0, %v2842_v13 }
 0x672   :  { %v2844_v63 = vpop.permute.xlu1 %2843 }
 0x673   :  { %3123 = vst.msk [vmem:[%s5026_s5 + $0x38] sm:$0xff] %vm197_vm0, %v2844_v63 }
 0x674   :  { %3624 = dma.done.wait [#allocation3], 1024  }
 0x675   :  { %3625 = vsyncadd [#allocation3], 4294966272 }
 0x676   :  { %2873 = vsyncpa [#allocation3], 1 }

</bundles_post_ra>
